<compile_context>
chip_gen: v6e
topology: v6e:2x2x1
jax: 0.10.0
libtpu: 0.0.40
codegen_flags: <defaults>
</compile_context>

<pallas_src>
import functools
import math

import jax
import jax.numpy as jnp
from jax import lax
from jax.experimental import pallas as pl
from jax.experimental.pallas import tpu as pltpu


# ----------------------------------------------------------------------------
# Fused MHA kernel: one (batch, query-tile) grid step
# ----------------------------------------------------------------------------
def _mha_kernel(*refs, n_heads, head_dim, scale_inv, has_mask):
    if has_mask:
        (q_ref, k_ref, v_ref,
         wq_ref, wk_ref, wv_ref, wo_ref,
         bq_ref, bk_ref, bv_ref, bo_ref, mask_ref,
         x_ref, dist_ref,
         kproj, vproj, attn_cat) = refs
    else:
        (q_ref, k_ref, v_ref,
         wq_ref, wk_ref, wv_ref, wo_ref,
         bq_ref, bk_ref, bv_ref, bo_ref,
         x_ref, dist_ref,
         kproj, vproj, attn_cat) = refs
        mask_ref = None

    qt = pl.program_id(1)

    # K/V projections for ALL heads -- one [S,D]x[D,D] matmul each, computed
    # once per batch element and kept VMEM-resident (bf16) across query tiles.
    @pl.when(qt == 0)
    def _():
        xk = k_ref[0].astype(jnp.bfloat16)          # [S, D]
        xv = v_ref[0].astype(jnp.bfloat16)          # [S, D]
        kproj[...] = (jnp.dot(xk, wk_ref[...], preferred_element_type=jnp.float32)
                      + bk_ref[...]).astype(jnp.bfloat16)
        vproj[...] = (jnp.dot(xv, wv_ref[...], preferred_element_type=jnp.float32)
                      + bv_ref[...]).astype(jnp.bfloat16)

    # Q projection for this query tile, all heads at once; fold in 1/sqrt(hd).
    xq = q_ref[0].astype(jnp.bfloat16)              # [Tq, D]
    qf = jnp.dot(xq, wq_ref[...], preferred_element_type=jnp.float32) + bq_ref[...]
    q_all = (qf * scale_inv).astype(jnp.bfloat16)   # [Tq, D]

    add_mask = mask_ref[0] if has_mask else None    # [Tq, S] additive f32

    # Per-head attention (static unrolled loop -> static column slices only).
    for h in range(n_heads):
        lo = h * head_dim
        hi = lo + head_dim
        qh = q_all[:, lo:hi]                        # [Tq, hd] bf16
        kh = kproj[:, lo:hi]                        # [S,  hd] bf16
        vh = vproj[:, lo:hi]                        # [S,  hd] bf16

        s = lax.dot_general(qh, kh, (((1,), (1,)), ((), ())),
                            preferred_element_type=jnp.float32)   # [Tq, S]
        if add_mask is not None:
            s = s + add_mask

        m = jnp.max(s, axis=-1, keepdims=True)
        e = jnp.exp(s - m)
        inv = 1.0 / jnp.sum(e, axis=-1, keepdims=True)   # exact: dist rows sum to 1
        p = e * inv

        dist_ref[0, h] = p.astype(dist_ref.dtype)

        attn = jnp.dot(p.astype(jnp.bfloat16), vh,
                       preferred_element_type=jnp.float32)        # [Tq, hd]
        attn_cat[:, lo:hi] = attn.astype(jnp.bfloat16)

    # ONE fc_o matmul for all heads: [Tq, D] x [D, D] (full-depth contraction).
    x = jnp.dot(attn_cat[...], wo_ref[...], preferred_element_type=jnp.float32)
    x_ref[0] = (x + bo_ref[...]).astype(x_ref.dtype)


# ----------------------------------------------------------------------------
# Wrapper
# ----------------------------------------------------------------------------
def _pick_q_tile(T):
    for t in (512, 256, 128, 64, 32, 16, 8):
        if T % t == 0:
            return t
    return T


def _vmem_limit_bytes():
    # Per-generation VMEM budget with headroom (v5e/v6e: 128 MiB, v7x: 64 MiB).
    cap = 64 * 1024 * 1024
    try:
        info = pltpu.get_tpu_info()
        cap = int(getattr(info, "vmem_capacity_bytes", cap))
    except Exception:
        pass
    return max(32 * 1024 * 1024, cap - 16 * 1024 * 1024)


def mha_forward(params, Q, K, V, mask=None, *, n_heads, q_tile=None):
    B, T, D = Q.shape
    S = K.shape[1]
    H = n_heads
    assert D % H == 0
    hd = D // H
    Tq = q_tile if q_tile is not None else _pick_q_tile(T)
    assert T % Tq == 0
    NQ = T // Tq

    bq2 = params["bq"].reshape(1, D)
    bk2 = params["bk"].reshape(1, D)
    bv2 = params["bv"].reshape(1, D)
    bo2 = params["bo"].reshape(1, D)

    q_spec = pl.BlockSpec((1, Tq, D), lambda b, qt: (b, qt, 0))
    kv_spec = pl.BlockSpec((1, S, D), lambda b, qt: (b, 0, 0))   # fetched once per b
    w_spec = pl.BlockSpec((D, D), lambda b, qt: (0, 0))          # resident bf16 weights
    b_spec = pl.BlockSpec((1, D), lambda b, qt: (0, 0))

    inputs = [Q, K, V,
              params["wq_t"], params["wk_t"], params["wv_t"], params["wo_t"],
              bq2, bk2, bv2, bo2]
    in_specs = [q_spec, kv_spec, kv_spec,
                w_spec, w_spec, w_spec, w_spec,
                b_spec, b_spec, b_spec, b_spec]

    has_mask = mask is not None
    if has_mask:
        m = jnp.asarray(mask, dtype=bool)
        if m.ndim == 4:
            # TODO(synk): per-head masks are not supported; head dim must be broadcast.
            assert m.shape[1] == 1
            m = m[:, 0]
        m = jnp.broadcast_to(m, jnp.broadcast_shapes(m.shape, (1, T, S)))
        Bm = m.shape[0]                      # 1 (batch-invariant) or B
        # masked_fill(mask, -1e10) -> precomputed additive mask
        mask_add = jnp.where(m, jnp.float32(-1e10), jnp.float32(0.0))
        inputs.append(mask_add)
        if Bm == 1:
            in_specs.append(pl.BlockSpec((1, Tq, S), lambda b, qt: (0, qt, 0)))
        else:
            in_specs.append(pl.BlockSpec((1, Tq, S), lambda b, qt: (b, qt, 0)))

    kernel = functools.partial(
        _mha_kernel, n_heads=H, head_dim=hd,
        scale_inv=float(1.0 / math.sqrt(hd)), has_mask=has_mask)

    x, dist = pl.pallas_call(
        kernel,
        grid=(B, NQ),
        in_specs=in_specs,
        out_specs=(pl.BlockSpec((1, Tq, D), lambda b, qt: (b, qt, 0)),
                   pl.BlockSpec((1, H, Tq, S), lambda b, qt: (b, 0, qt, 0))),
        out_shape=(jax.ShapeDtypeStruct((B, T, D), Q.dtype),
                   jax.ShapeDtypeStruct((B, H, T, S), Q.dtype)),
        scratch_shapes=[pltpu.VMEM((S, D), jnp.bfloat16),    # projected K (all heads)
                        pltpu.VMEM((S, D), jnp.bfloat16),    # projected V (all heads)
                        pltpu.VMEM((Tq, D), jnp.bfloat16)],  # concat of head outputs
        compiler_params=pltpu.CompilerParams(
            dimension_semantics=("parallel", "arbitrary"),
            vmem_limit_bytes=_vmem_limit_bytes()),
    )(*inputs)
    return x, dist


# ----------------------------------------------------------------------------
# Parameters (torch nn.Linear layout: weight [out, in], bias [out])
# ----------------------------------------------------------------------------
def init_params(key, d_model):
    ks = jax.random.split(key, 8)

    def w(k):
        return jax.random.normal(k, (d_model, d_model), jnp.float32) * 0.05

    def b(k):
        return jax.random.normal(k, (d_model,), jnp.float32) * 0.05

    wq, wk, wv, wo = w(ks[0]), w(ks[1]), w(ks[2]), w(ks[3])
    p = dict(wq=wq, wk=wk, wv=wv, wo=wo,
             bq=b(ks[4]), bk=b(ks[5]), bv=b(ks[6]), bo=b(ks[7]))
    # Pre-transpose to [in, out] and pre-cast to bf16 ONCE at init: MXU-ready,
    # half the weight HBM traffic / VMEM, no per-call w.T or in-kernel casts.
    p.update(wq_t=wq.T.astype(jnp.bfloat16),
             wk_t=wk.T.astype(jnp.bfloat16),
             wv_t=wv.T.astype(jnp.bfloat16),
             wo_t=wo.T.astype(jnp.bfloat16))
    return p


# ----------------------------------------------------------------------------
# Pure-JAX reference (mirrors the PyTorch module, f32 throughout)
# ----------------------------------------------------------------------------
def mha_reference(params, Q, K, V, mask=None, *, n_heads):
    B, T, D = Q.shape
    S = K.shape[1]
    H = n_heads
    hd = D // H
    q = Q @ params["wq"].T + params["bq"]
    k = K @ params["wk"].T + params["bk"]
    v = V @ params["wv"].T + params["bv"]
    q = q.reshape(B, T, H, hd).transpose(0, 2, 1, 3)
    k = k.reshape(B, S, H, hd).transpose(0, 2, 1, 3)
    v = v.reshape(B, S, H, hd).transpose(0, 2, 1, 3)
    s = jnp.einsum("bhtd,bhsd->bhts", q, k) / math.sqrt(hd)
    if mask is not None:
        mb = jnp.broadcast_to(jnp.asarray(mask, bool), (B, T, S))[:, None]
        s = jnp.where(mb, -1e10, s)
    p = jax.nn.softmax(s, axis=-1)
    attn = jnp.einsum("bhts,bhsd->bhtd", p, v)
    x = attn.transpose(0, 2, 1, 3).reshape(B, T, D)
    x = x @ params["wo"].T + params["bo"]
    return x, p


# ----------------------------------------------------------------------------
if __name__ == "__main__":
    B, T, S = 2, 8, 8
    d_model, n_heads = 64, 4

    key = jax.random.PRNGKey(0)
    kq, kk, kv, kp = jax.random.split(key, 4)
    Q = jax.random.normal(kq, (B, T, d_model), jnp.float32)
    K = jax.random.normal(kk, (B, S, d_model), jnp.float32)
    V = jax.random.normal(kv, (B, S, d_model), jnp.float32)
    params = init_params(kp, d_model)

    # boolean mask (True = masked): causal, batch/head-invariant -> [T, S]
    mask = jnp.triu(jnp.ones((T, S), jnp.bool_), k=1)

    fwd = jax.jit(functools.partial(mha_forward, n_heads=n_heads))

    # masked path
    x, dist = fwd(params, Q, K, V, mask)
    jax.block_until_ready((x, dist))
    x_ref, dist_ref = mha_reference(params, Q, K, V, mask, n_heads=n_heads)
    assert x.shape == (B, T, d_model)
    assert dist.shape == (B, n_heads, T, S)
    # bf16 MXU operands -> loose but tight-enough tolerance
    assert float(jnp.max(jnp.abs(x - x_ref))) < 2e-2
    assert float(jnp.max(jnp.abs(dist - dist_ref))) < 2e-2

    # unmasked path
    x2, dist2 = fwd(params, Q, K, V)
    jax.block_until_ready((x2, dist2))
    x2_ref, dist2_ref = mha_reference(params, Q, K, V, None, n_heads=n_heads)
    assert float(jnp.max(jnp.abs(x2 - x2_ref))) < 2e-2
    assert float(jnp.max(jnp.abs(dist2 - dist2_ref))) < 2e-2

    print("KERNEL_OK")
</pallas_src>

<mosaic_0001>
module attributes {stable_mosaic.version = 11 : i64} {
  func.func @_mha_kernel(%arg0: i32, %arg1: i32, %arg2: memref<1x8x64xf32, #tpu.memory_space<vmem>>, %arg3: memref<1x8x64xf32, #tpu.memory_space<vmem>>, %arg4: memref<1x8x64xf32, #tpu.memory_space<vmem>>, %arg5: memref<64x64xbf16, #tpu.memory_space<vmem>>, %arg6: memref<64x64xbf16, #tpu.memory_space<vmem>>, %arg7: memref<64x64xbf16, #tpu.memory_space<vmem>>, %arg8: memref<64x64xbf16, #tpu.memory_space<vmem>>, %arg9: memref<1x64xf32, #tpu.memory_space<vmem>>, %arg10: memref<1x64xf32, #tpu.memory_space<vmem>>, %arg11: memref<1x64xf32, #tpu.memory_space<vmem>>, %arg12: memref<1x64xf32, #tpu.memory_space<vmem>>, %arg13: memref<1x8x8xf32, #tpu.memory_space<vmem>>, %arg14: memref<1x8x64xf32, #tpu.memory_space<vmem>>, %arg15: memref<1x4x8x8xf32, #tpu.memory_space<vmem>>, %arg16: memref<8x64xbf16, #tpu.memory_space<vmem>>, %arg17: memref<8x64xbf16, #tpu.memory_space<vmem>>, %arg18: memref<8x64xbf16, #tpu.memory_space<vmem>>) attributes {dimension_semantics = [#tpu.dimension_semantics<parallel>, #tpu.dimension_semantics<arbitrary>], iteration_bounds = array<i64: 2, 1>, scalar_prefetch = 0 : i64, scratch_operands = 3 : i64, tpu.core_type = #tpu.core_type<tc>, window_params = [{transform_indices = @transform_0, window_bounds = array<i64: 1, 8, 64>}, {transform_indices = @transform_1, window_bounds = array<i64: 1, 8, 64>}, {transform_indices = @transform_2, window_bounds = array<i64: 1, 8, 64>}, {pipeline_mode = #tpu.pipeline_mode<synchronous>, transform_indices = @transform_3, window_bounds = array<i64: 64, 64>}, {pipeline_mode = #tpu.pipeline_mode<synchronous>, transform_indices = @transform_4, window_bounds = array<i64: 64, 64>}, {pipeline_mode = #tpu.pipeline_mode<synchronous>, transform_indices = @transform_5, window_bounds = array<i64: 64, 64>}, {pipeline_mode = #tpu.pipeline_mode<synchronous>, transform_indices = @transform_6, window_bounds = array<i64: 64, 64>}, {pipeline_mode = #tpu.pipeline_mode<synchronous>, transform_indices = @transform_7, window_bounds = array<i64: 1, 64>}, {pipeline_mode = #tpu.pipeline_mode<synchronous>, transform_indices = @transform_8, window_bounds = array<i64: 1, 64>}, {pipeline_mode = #tpu.pipeline_mode<synchronous>, transform_indices = @transform_9, window_bounds = array<i64: 1, 64>}, {pipeline_mode = #tpu.pipeline_mode<synchronous>, transform_indices = @transform_10, window_bounds = array<i64: 1, 64>}, {transform_indices = @transform_11, window_bounds = array<i64: 1, 8, 8>}, {transform_indices = @transform_12, window_bounds = array<i64: 1, 8, 64>}, {transform_indices = @transform_13, window_bounds = array<i64: 1, 4, 8, 8>}]} {
    %c0_i32 = arith.constant 0 : i32
    %0 = arith.cmpi eq, %arg1, %c0_i32 : i32
    %1 = arith.extui %0 : i1 to i32
    %c0_i32_0 = arith.constant 0 : i32
    %2 = arith.cmpi ne, %1, %c0_i32_0 : i32
    scf.if %2 {
      %c0_75 = arith.constant 0 : index
      %c0_76 = arith.constant 0 : index
      %c0_77 = arith.constant 0 : index
      %117 = vector.load %arg3[%c0_75, %c0_76, %c0_77] : memref<1x8x64xf32, #tpu.memory_space<vmem>>, vector<1x8x64xf32>
      %118 = vector.shape_cast %117 : vector<1x8x64xf32> to vector<8x64xf32>
      %119 = arith.truncf %118 : vector<8x64xf32> to vector<8x64xbf16>
      %c0_78 = arith.constant 0 : index
      %c0_79 = arith.constant 0 : index
      %c0_80 = arith.constant 0 : index
      %120 = vector.load %arg4[%c0_78, %c0_79, %c0_80] : memref<1x8x64xf32, #tpu.memory_space<vmem>>, vector<1x8x64xf32>
      %121 = vector.shape_cast %120 : vector<1x8x64xf32> to vector<8x64xf32>
      %122 = arith.truncf %121 : vector<8x64xf32> to vector<8x64xbf16>
      %c0_81 = arith.constant 0 : index
      %c0_82 = arith.constant 0 : index
      %123 = vector.load %arg6[%c0_81, %c0_82] : memref<64x64xbf16, #tpu.memory_space<vmem>>, vector<64x64xbf16>
      %cst_83 = arith.constant dense<0.000000e+00> : vector<8x64xf32>
      %124 = tpu.matmul %119, %123, %cst_83 {dimension_numbers = #tpu.dot_dimension_numbers<[1], [0], [0], [1], [0, 0, 1, 1], [], []>} : vector<8x64xbf16>, vector<64x64xbf16>, vector<8x64xf32> -> vector<8x64xf32>
      %c0_84 = arith.constant 0 : index
      %c0_85 = arith.constant 0 : index
      %125 = vector.load %arg10[%c0_84, %c0_85] : memref<1x64xf32, #tpu.memory_space<vmem>>, vector<1x64xf32>
      %126 = vector.broadcast %125 : vector<1x64xf32> to vector<8x64xf32>
      %127 = arith.addf %124, %126 : vector<8x64xf32>
      %128 = arith.truncf %127 : vector<8x64xf32> to vector<8x64xbf16>
      %c0_86 = arith.constant 0 : index
      %c0_87 = arith.constant 0 : index
      %129 = vector.load %arg16[%c0_86, %c0_87] : memref<8x64xbf16, #tpu.memory_space<vmem>>, vector<8x64xbf16>
      tpu.vector_store %arg16[%c0_86, %c0_87], %128 {strides = array<i32>} : memref<8x64xbf16, #tpu.memory_space<vmem>>, vector<8x64xbf16>,
      %c0_88 = arith.constant 0 : index
      %c0_89 = arith.constant 0 : index
      %130 = vector.load %arg7[%c0_88, %c0_89] : memref<64x64xbf16, #tpu.memory_space<vmem>>, vector<64x64xbf16>
      %cst_90 = arith.constant dense<0.000000e+00> : vector<8x64xf32>
      %131 = tpu.matmul %122, %130, %cst_90 {dimension_numbers = #tpu.dot_dimension_numbers<[1], [0], [0], [1], [0, 0, 1, 1], [], []>} : vector<8x64xbf16>, vector<64x64xbf16>, vector<8x64xf32> -> vector<8x64xf32>
      %c0_91 = arith.constant 0 : index
      %c0_92 = arith.constant 0 : index
      %132 = vector.load %arg11[%c0_91, %c0_92] : memref<1x64xf32, #tpu.memory_space<vmem>>, vector<1x64xf32>
      %133 = vector.broadcast %132 : vector<1x64xf32> to vector<8x64xf32>
      %134 = arith.addf %131, %133 : vector<8x64xf32>
      %135 = arith.truncf %134 : vector<8x64xf32> to vector<8x64xbf16>
      %c0_93 = arith.constant 0 : index
      %c0_94 = arith.constant 0 : index
      %136 = vector.load %arg17[%c0_93, %c0_94] : memref<8x64xbf16, #tpu.memory_space<vmem>>, vector<8x64xbf16>
      tpu.vector_store %arg17[%c0_93, %c0_94], %135 {strides = array<i32>} : memref<8x64xbf16, #tpu.memory_space<vmem>>, vector<8x64xbf16>,
    } else {
    }
    %c0 = arith.constant 0 : index
    %c0_1 = arith.constant 0 : index
    %c0_2 = arith.constant 0 : index
    %3 = vector.load %arg2[%c0, %c0_1, %c0_2] : memref<1x8x64xf32, #tpu.memory_space<vmem>>, vector<1x8x64xf32>
    %4 = vector.shape_cast %3 : vector<1x8x64xf32> to vector<8x64xf32>
    %5 = arith.truncf %4 : vector<8x64xf32> to vector<8x64xbf16>
    %c0_3 = arith.constant 0 : index
    %c0_4 = arith.constant 0 : index
    %6 = vector.load %arg5[%c0_3, %c0_4] : memref<64x64xbf16, #tpu.memory_space<vmem>>, vector<64x64xbf16>
    %cst = arith.constant dense<0.000000e+00> : vector<8x64xf32>
    %7 = tpu.matmul %5, %6, %cst {dimension_numbers = #tpu.dot_dimension_numbers<[1], [0], [0], [1], [0, 0, 1, 1], [], []>} : vector<8x64xbf16>, vector<64x64xbf16>, vector<8x64xf32> -> vector<8x64xf32>
    %c0_5 = arith.constant 0 : index
    %c0_6 = arith.constant 0 : index
    %8 = vector.load %arg9[%c0_5, %c0_6] : memref<1x64xf32, #tpu.memory_space<vmem>>, vector<1x64xf32>
    %9 = vector.broadcast %8 : vector<1x64xf32> to vector<8x64xf32>
    %10 = arith.addf %7, %9 : vector<8x64xf32>
    %cst_7 = arith.constant 2.500000e-01 : f32
    %11 = vector.broadcast %cst_7 : f32 to vector<8x64xf32>
    %12 = arith.mulf %10, %11 : vector<8x64xf32>
    %13 = arith.truncf %12 : vector<8x64xf32> to vector<8x64xbf16>
    %c0_8 = arith.constant 0 : index
    %c0_9 = arith.constant 0 : index
    %c0_10 = arith.constant 0 : index
    %14 = vector.load %arg13[%c0_8, %c0_9, %c0_10] : memref<1x8x8xf32, #tpu.memory_space<vmem>>, vector<1x8x8xf32>
    %15 = vector.shape_cast %14 : vector<1x8x8xf32> to vector<8x8xf32>
    %16 = vector.extract_strided_slice %13 {offsets = [0, 0], sizes = [8, 16], strides = [1, 1]} : vector<8x64xbf16> to vector<8x16xbf16>
    %c0_11 = arith.constant 0 : index
    %c0_12 = arith.constant 0 : index
    %17 = vector.load %arg16[%c0_11, %c0_12] : memref<8x64xbf16, #tpu.memory_space<vmem>>, vector<8x16xbf16>
    %c0_13 = arith.constant 0 : index
    %c0_14 = arith.constant 0 : index
    %18 = vector.load %arg17[%c0_13, %c0_14] : memref<8x64xbf16, #tpu.memory_space<vmem>>, vector<8x16xbf16>
    %cst_15 = arith.constant dense<0.000000e+00> : vector<8x8xf32>
    %19 = tpu.matmul %16, %17, %cst_15 {dimension_numbers = #tpu.dot_dimension_numbers<[1], [1], [0], [0], [0, 0, 1, 0], [], []>} : vector<8x16xbf16>, vector<8x16xbf16>, vector<8x8xf32> -> vector<8x8xf32>
    %20 = arith.addf %19, %15 : vector<8x8xf32>
    %cst_16 = arith.constant dense<0xFF800000> : vector<8xf32>
    %21 = vector.multi_reduction <maximumf>, %20, %cst_16 [1] : vector<8x8xf32> to vector<8xf32>
    %22 = vector.shape_cast %21 : vector<8xf32> to vector<8x1xf32>
    %23 = vector.broadcast %22 : vector<8x1xf32> to vector<8x8xf32>
    %24 = arith.subf %20, %23 : vector<8x8xf32>
    %25 = math.exp %24 : vector<8x8xf32>
    %cst_17 = arith.constant dense<0.000000e+00> : vector<8xf32>
    %26 = vector.multi_reduction <add>, %25, %cst_17 [1] : vector<8x8xf32> to vector<8xf32>
    %27 = vector.shape_cast %26 : vector<8xf32> to vector<8x1xf32>
    %cst_18 = arith.constant 1.000000e+00 : f32
    %28 = vector.broadcast %cst_18 : f32 to vector<8x1xf32>
    %29 = arith.divf %28, %27 : vector<8x1xf32>
    %30 = vector.broadcast %29 : vector<8x1xf32> to vector<8x8xf32>
    %31 = arith.mulf %25, %30 : vector<8x8xf32>
    %c0_19 = arith.constant 0 : index
    %c0_20 = arith.constant 0 : index
    %c0_21 = arith.constant 0 : index
    %c0_22 = arith.constant 0 : index
    %32 = vector.load %arg15[%c0_19, %c0_20, %c0_21, %c0_22] : memref<1x4x8x8xf32, #tpu.memory_space<vmem>>, vector<1x1x8x8xf32>
    %33 = vector.shape_cast %32 : vector<1x1x8x8xf32> to vector<8x8xf32>
    %34 = vector.shape_cast %31 : vector<8x8xf32> to vector<1x1x8x8xf32>
    tpu.vector_store %arg15[%c0_19, %c0_20, %c0_21, %c0_22], %34 {strides = array<i32>} : memref<1x4x8x8xf32, #tpu.memory_space<vmem>>, vector<1x1x8x8xf32>,
    %35 = arith.truncf %31 : vector<8x8xf32> to vector<8x8xbf16>
    %cst_23 = arith.constant dense<0.000000e+00> : vector<8x16xf32>
    %36 = tpu.matmul %35, %18, %cst_23 {dimension_numbers = #tpu.dot_dimension_numbers<[1], [0], [0], [1], [0, 0, 1, 1], [], []>} : vector<8x8xbf16>, vector<8x16xbf16>, vector<8x16xf32> -> vector<8x16xf32>
    %37 = arith.truncf %36 : vector<8x16xf32> to vector<8x16xbf16>
    %c0_24 = arith.constant 0 : index
    %c0_25 = arith.constant 0 : index
    %38 = vector.load %arg18[%c0_24, %c0_25] : memref<8x64xbf16, #tpu.memory_space<vmem>>, vector<8x16xbf16>
    tpu.vector_store %arg18[%c0_24, %c0_25], %37 {strides = array<i32>} : memref<8x64xbf16, #tpu.memory_space<vmem>>, vector<8x16xbf16>,
    %39 = vector.extract_strided_slice %13 {offsets = [0, 16], sizes = [8, 16], strides = [1, 1]} : vector<8x64xbf16> to vector<8x16xbf16>
    %c0_26 = arith.constant 0 : index
    %c16 = arith.constant 16 : index
    %40 = vector.load %arg16[%c0_26, %c16] : memref<8x64xbf16, #tpu.memory_space<vmem>>, vector<8x16xbf16>
    %c0_27 = arith.constant 0 : index
    %c16_28 = arith.constant 16 : index
    %41 = vector.load %arg17[%c0_27, %c16_28] : memref<8x64xbf16, #tpu.memory_space<vmem>>, vector<8x16xbf16>
    %cst_29 = arith.constant dense<0.000000e+00> : vector<8x8xf32>
    %42 = tpu.matmul %39, %40, %cst_29 {dimension_numbers = #tpu.dot_dimension_numbers<[1], [1], [0], [0], [0, 0, 1, 0], [], []>} : vector<8x16xbf16>, vector<8x16xbf16>, vector<8x8xf32> -> vector<8x8xf32>
    %43 = arith.addf %42, %15 : vector<8x8xf32>
    %cst_30 = arith.constant dense<0xFF800000> : vector<8xf32>
    %44 = vector.multi_reduction <maximumf>, %43, %cst_30 [1] : vector<8x8xf32> to vector<8xf32>
    %45 = vector.shape_cast %44 : vector<8xf32> to vector<8x1xf32>
    %46 = vector.broadcast %45 : vector<8x1xf32> to vector<8x8xf32>
    %47 = arith.subf %43, %46 : vector<8x8xf32>
    %48 = math.exp %47 : vector<8x8xf32>
    %cst_31 = arith.constant dense<0.000000e+00> : vector<8xf32>
    %49 = vector.multi_reduction <add>, %48, %cst_31 [1] : vector<8x8xf32> to vector<8xf32>
    %50 = vector.shape_cast %49 : vector<8xf32> to vector<8x1xf32>
    %cst_32 = arith.constant 1.000000e+00 : f32
    %51 = vector.broadcast %cst_32 : f32 to vector<8x1xf32>
    %52 = arith.divf %51, %50 : vector<8x1xf32>
    %53 = vector.broadcast %52 : vector<8x1xf32> to vector<8x8xf32>
    %54 = arith.mulf %48, %53 : vector<8x8xf32>
    %c0_33 = arith.constant 0 : index
    %c1 = arith.constant 1 : index
    %c0_34 = arith.constant 0 : index
    %c0_35 = arith.constant 0 : index
    %55 = vector.load %arg15[%c0_33, %c1, %c0_34, %c0_35] : memref<1x4x8x8xf32, #tpu.memory_space<vmem>>, vector<1x1x8x8xf32>
    %56 = vector.shape_cast %55 : vector<1x1x8x8xf32> to vector<8x8xf32>
    %57 = vector.shape_cast %54 : vector<8x8xf32> to vector<1x1x8x8xf32>
    tpu.vector_store %arg15[%c0_33, %c1, %c0_34, %c0_35], %57 {strides = array<i32>} : memref<1x4x8x8xf32, #tpu.memory_space<vmem>>, vector<1x1x8x8xf32>,
    %58 = arith.truncf %54 : vector<8x8xf32> to vector<8x8xbf16>
    %cst_36 = arith.constant dense<0.000000e+00> : vector<8x16xf32>
    %59 = tpu.matmul %58, %41, %cst_36 {dimension_numbers = #tpu.dot_dimension_numbers<[1], [0], [0], [1], [0, 0, 1, 1], [], []>} : vector<8x8xbf16>, vector<8x16xbf16>, vector<8x16xf32> -> vector<8x16xf32>
    %60 = arith.truncf %59 : vector<8x16xf32> to vector<8x16xbf16>
    %c0_37 = arith.constant 0 : index
    %c16_38 = arith.constant 16 : index
    %61 = vector.load %arg18[%c0_37, %c16_38] : memref<8x64xbf16, #tpu.memory_space<vmem>>, vector<8x16xbf16>
    tpu.vector_store %arg18[%c0_37, %c16_38], %60 {strides = array<i32>} : memref<8x64xbf16, #tpu.memory_space<vmem>>, vector<8x16xbf16>,
    %62 = vector.extract_strided_slice %13 {offsets = [0, 32], sizes = [8, 16], strides = [1, 1]} : vector<8x64xbf16> to vector<8x16xbf16>
    %c0_39 = arith.constant 0 : index
    %c32 = arith.constant 32 : index
    %63 = vector.load %arg16[%c0_39, %c32] : memref<8x64xbf16, #tpu.memory_space<vmem>>, vector<8x16xbf16>
    %c0_40 = arith.constant 0 : index
    %c32_41 = arith.constant 32 : index
    %64 = vector.load %arg17[%c0_40, %c32_41] : memref<8x64xbf16, #tpu.memory_space<vmem>>, vector<8x16xbf16>
    %cst_42 = arith.constant dense<0.000000e+00> : vector<8x8xf32>
    %65 = tpu.matmul %62, %63, %cst_42 {dimension_numbers = #tpu.dot_dimension_numbers<[1], [1], [0], [0], [0, 0, 1, 0], [], []>} : vector<8x16xbf16>, vector<8x16xbf16>, vector<8x8xf32> -> vector<8x8xf32>
    %66 = arith.addf %65, %15 : vector<8x8xf32>
    %cst_43 = arith.constant dense<0xFF800000> : vector<8xf32>
    %67 = vector.multi_reduction <maximumf>, %66, %cst_43 [1] : vector<8x8xf32> to vector<8xf32>
    %68 = vector.shape_cast %67 : vector<8xf32> to vector<8x1xf32>
    %69 = vector.broadcast %68 : vector<8x1xf32> to vector<8x8xf32>
    %70 = arith.subf %66, %69 : vector<8x8xf32>
    %71 = math.exp %70 : vector<8x8xf32>
    %cst_44 = arith.constant dense<0.000000e+00> : vector<8xf32>
    %72 = vector.multi_reduction <add>, %71, %cst_44 [1] : vector<8x8xf32> to vector<8xf32>
    %73 = vector.shape_cast %72 : vector<8xf32> to vector<8x1xf32>
    %cst_45 = arith.constant 1.000000e+00 : f32
    %74 = vector.broadcast %cst_45 : f32 to vector<8x1xf32>
    %75 = arith.divf %74, %73 : vector<8x1xf32>
    %76 = vector.broadcast %75 : vector<8x1xf32> to vector<8x8xf32>
    %77 = arith.mulf %71, %76 : vector<8x8xf32>
    %c0_46 = arith.constant 0 : index
    %c2 = arith.constant 2 : index
    %c0_47 = arith.constant 0 : index
    %c0_48 = arith.constant 0 : index
    %78 = vector.load %arg15[%c0_46, %c2, %c0_47, %c0_48] : memref<1x4x8x8xf32, #tpu.memory_space<vmem>>, vector<1x1x8x8xf32>
    %79 = vector.shape_cast %78 : vector<1x1x8x8xf32> to vector<8x8xf32>
    %80 = vector.shape_cast %77 : vector<8x8xf32> to vector<1x1x8x8xf32>
    tpu.vector_store %arg15[%c0_46, %c2, %c0_47, %c0_48], %80 {strides = array<i32>} : memref<1x4x8x8xf32, #tpu.memory_space<vmem>>, vector<1x1x8x8xf32>,
    %81 = arith.truncf %77 : vector<8x8xf32> to vector<8x8xbf16>
    %cst_49 = arith.constant dense<0.000000e+00> : vector<8x16xf32>
    %82 = tpu.matmul %81, %64, %cst_49 {dimension_numbers = #tpu.dot_dimension_numbers<[1], [0], [0], [1], [0, 0, 1, 1], [], []>} : vector<8x8xbf16>, vector<8x16xbf16>, vector<8x16xf32> -> vector<8x16xf32>
    %83 = arith.truncf %82 : vector<8x16xf32> to vector<8x16xbf16>
    %c0_50 = arith.constant 0 : index
    %c32_51 = arith.constant 32 : index
    %84 = vector.load %arg18[%c0_50, %c32_51] : memref<8x64xbf16, #tpu.memory_space<vmem>>, vector<8x16xbf16>
    tpu.vector_store %arg18[%c0_50, %c32_51], %83 {strides = array<i32>} : memref<8x64xbf16, #tpu.memory_space<vmem>>, vector<8x16xbf16>,
    %85 = vector.extract_strided_slice %13 {offsets = [0, 48], sizes = [8, 16], strides = [1, 1]} : vector<8x64xbf16> to vector<8x16xbf16>
    %c0_52 = arith.constant 0 : index
    %c48 = arith.constant 48 : index
    %86 = vector.load %arg16[%c0_52, %c48] : memref<8x64xbf16, #tpu.memory_space<vmem>>, vector<8x16xbf16>
    %c0_53 = arith.constant 0 : index
    %c48_54 = arith.constant 48 : index
    %87 = vector.load %arg17[%c0_53, %c48_54] : memref<8x64xbf16, #tpu.memory_space<vmem>>, vector<8x16xbf16>
    %cst_55 = arith.constant dense<0.000000e+00> : vector<8x8xf32>
    %88 = tpu.matmul %85, %86, %cst_55 {dimension_numbers = #tpu.dot_dimension_numbers<[1], [1], [0], [0], [0, 0, 1, 0], [], []>} : vector<8x16xbf16>, vector<8x16xbf16>, vector<8x8xf32> -> vector<8x8xf32>
    %89 = arith.addf %88, %15 : vector<8x8xf32>
    %cst_56 = arith.constant dense<0xFF800000> : vector<8xf32>
    %90 = vector.multi_reduction <maximumf>, %89, %cst_56 [1] : vector<8x8xf32> to vector<8xf32>
    %91 = vector.shape_cast %90 : vector<8xf32> to vector<8x1xf32>
    %92 = vector.broadcast %91 : vector<8x1xf32> to vector<8x8xf32>
    %93 = arith.subf %89, %92 : vector<8x8xf32>
    %94 = math.exp %93 : vector<8x8xf32>
    %cst_57 = arith.constant dense<0.000000e+00> : vector<8xf32>
    %95 = vector.multi_reduction <add>, %94, %cst_57 [1] : vector<8x8xf32> to vector<8xf32>
    %96 = vector.shape_cast %95 : vector<8xf32> to vector<8x1xf32>
    %cst_58 = arith.constant 1.000000e+00 : f32
    %97 = vector.broadcast %cst_58 : f32 to vector<8x1xf32>
    %98 = arith.divf %97, %96 : vector<8x1xf32>
    %99 = vector.broadcast %98 : vector<8x1xf32> to vector<8x8xf32>
    %100 = arith.mulf %94, %99 : vector<8x8xf32>
    %c0_59 = arith.constant 0 : index
    %c3 = arith.constant 3 : index
    %c0_60 = arith.constant 0 : index
    %c0_61 = arith.constant 0 : index
    %101 = vector.load %arg15[%c0_59, %c3, %c0_60, %c0_61] : memref<1x4x8x8xf32, #tpu.memory_space<vmem>>, vector<1x1x8x8xf32>
    %102 = vector.shape_cast %101 : vector<1x1x8x8xf32> to vector<8x8xf32>
    %103 = vector.shape_cast %100 : vector<8x8xf32> to vector<1x1x8x8xf32>
    tpu.vector_store %arg15[%c0_59, %c3, %c0_60, %c0_61], %103 {strides = array<i32>} : memref<1x4x8x8xf32, #tpu.memory_space<vmem>>, vector<1x1x8x8xf32>,
    %104 = arith.truncf %100 : vector<8x8xf32> to vector<8x8xbf16>
    %cst_62 = arith.constant dense<0.000000e+00> : vector<8x16xf32>
    %105 = tpu.matmul %104, %87, %cst_62 {dimension_numbers = #tpu.dot_dimension_numbers<[1], [0], [0], [1], [0, 0, 1, 1], [], []>} : vector<8x8xbf16>, vector<8x16xbf16>, vector<8x16xf32> -> vector<8x16xf32>
    %106 = arith.truncf %105 : vector<8x16xf32> to vector<8x16xbf16>
    %c0_63 = arith.constant 0 : index
    %c48_64 = arith.constant 48 : index
    %107 = vector.load %arg18[%c0_63, %c48_64] : memref<8x64xbf16, #tpu.memory_space<vmem>>, vector<8x16xbf16>
    tpu.vector_store %arg18[%c0_63, %c48_64], %106 {strides = array<i32>} : memref<8x64xbf16, #tpu.memory_space<vmem>>, vector<8x16xbf16>,
    %c0_65 = arith.constant 0 : index
    %c0_66 = arith.constant 0 : index
    %108 = vector.load %arg18[%c0_65, %c0_66] : memref<8x64xbf16, #tpu.memory_space<vmem>>, vector<8x64xbf16>
    %c0_67 = arith.constant 0 : index
    %c0_68 = arith.constant 0 : index
    %109 = vector.load %arg8[%c0_67, %c0_68] : memref<64x64xbf16, #tpu.memory_space<vmem>>, vector<64x64xbf16>
    %cst_69 = arith.constant dense<0.000000e+00> : vector<8x64xf32>
    %110 = tpu.matmul %108, %109, %cst_69 {dimension_numbers = #tpu.dot_dimension_numbers<[1], [0], [0], [1], [0, 0, 1, 1], [], []>} : vector<8x64xbf16>, vector<64x64xbf16>, vector<8x64xf32> -> vector<8x64xf32>
    %c0_70 = arith.constant 0 : index
    %c0_71 = arith.constant 0 : index
    %111 = vector.load %arg12[%c0_70, %c0_71] : memref<1x64xf32, #tpu.memory_space<vmem>>, vector<1x64xf32>
    %112 = vector.broadcast %111 : vector<1x64xf32> to vector<8x64xf32>
    %113 = arith.addf %110, %112 : vector<8x64xf32>
    %c0_72 = arith.constant 0 : index
    %c0_73 = arith.constant 0 : index
    %c0_74 = arith.constant 0 : index
    %114 = vector.load %arg14[%c0_72, %c0_73, %c0_74] : memref<1x8x64xf32, #tpu.memory_space<vmem>>, vector<1x8x64xf32>
    %115 = vector.shape_cast %114 : vector<1x8x64xf32> to vector<8x64xf32>
    %116 = vector.shape_cast %113 : vector<8x64xf32> to vector<1x8x64xf32>
    tpu.vector_store %arg14[%c0_72, %c0_73, %c0_74], %116 {strides = array<i32>} : memref<1x8x64xf32, #tpu.memory_space<vmem>>, vector<1x8x64xf32>,
    return
  }
  func.func @transform_0(%arg0: i32, %arg1: i32) -> (i32, i32, i32) {
    %c0_i32 = arith.constant 0 : i32
    %c0_i32_0 = arith.constant 0 : i32
    return %arg0, %arg1, %c0_i32 : i32, i32, i32
  }
  func.func @transform_1(%arg0: i32, %arg1: i32) -> (i32, i32, i32) {
    %c0_i32 = arith.constant 0 : i32
    %c0_i32_0 = arith.constant 0 : i32
    %c0_i32_1 = arith.constant 0 : i32
    return %arg0, %c0_i32, %c0_i32_0 : i32, i32, i32
  }
  func.func @transform_2(%arg0: i32, %arg1: i32) -> (i32, i32, i32) {
    %c0_i32 = arith.constant 0 : i32
    %c0_i32_0 = arith.constant 0 : i32
    %c0_i32_1 = arith.constant 0 : i32
    return %arg0, %c0_i32, %c0_i32_0 : i32, i32, i32
  }
  func.func @transform_3(%arg0: i32, %arg1: i32) -> (i32, i32) {
    %c0_i32 = arith.constant 0 : i32
    %c0_i32_0 = arith.constant 0 : i32
    %c0_i32_1 = arith.constant 0 : i32
    return %c0_i32, %c0_i32_0 : i32, i32
  }
  func.func @transform_4(%arg0: i32, %arg1: i32) -> (i32, i32) {
    %c0_i32 = arith.constant 0 : i32
    %c0_i32_0 = arith.constant 0 : i32
    %c0_i32_1 = arith.constant 0 : i32
    return %c0_i32, %c0_i32_0 : i32, i32
  }
  func.func @transform_5(%arg0: i32, %arg1: i32) -> (i32, i32) {
    %c0_i32 = arith.constant 0 : i32
    %c0_i32_0 = arith.constant 0 : i32
    %c0_i32_1 = arith.constant 0 : i32
    return %c0_i32, %c0_i32_0 : i32, i32
  }
  func.func @transform_6(%arg0: i32, %arg1: i32) -> (i32, i32) {
    %c0_i32 = arith.constant 0 : i32
    %c0_i32_0 = arith.constant 0 : i32
    %c0_i32_1 = arith.constant 0 : i32
    return %c0_i32, %c0_i32_0 : i32, i32
  }
  func.func @transform_7(%arg0: i32, %arg1: i32) -> (i32, i32) {
    %c0_i32 = arith.constant 0 : i32
    %c0_i32_0 = arith.constant 0 : i32
    %c0_i32_1 = arith.constant 0 : i32
    return %c0_i32, %c0_i32_0 : i32, i32
  }
  func.func @transform_8(%arg0: i32, %arg1: i32) -> (i32, i32) {
    %c0_i32 = arith.constant 0 : i32
    %c0_i32_0 = arith.constant 0 : i32
    %c0_i32_1 = arith.constant 0 : i32
    return %c0_i32, %c0_i32_0 : i32, i32
  }
  func.func @transform_9(%arg0: i32, %arg1: i32) -> (i32, i32) {
    %c0_i32 = arith.constant 0 : i32
    %c0_i32_0 = arith.constant 0 : i32
    %c0_i32_1 = arith.constant 0 : i32
    return %c0_i32, %c0_i32_0 : i32, i32
  }
  func.func @transform_10(%arg0: i32, %arg1: i32) -> (i32, i32) {
    %c0_i32 = arith.constant 0 : i32
    %c0_i32_0 = arith.constant 0 : i32
    %c0_i32_1 = arith.constant 0 : i32
    return %c0_i32, %c0_i32_0 : i32, i32
  }
  func.func @transform_11(%arg0: i32, %arg1: i32) -> (i32, i32, i32) {
    %c0_i32 = arith.constant 0 : i32
    %c0_i32_0 = arith.constant 0 : i32
    %c0_i32_1 = arith.constant 0 : i32
    return %c0_i32, %arg1, %c0_i32_0 : i32, i32, i32
  }
  func.func @transform_12(%arg0: i32, %arg1: i32) -> (i32, i32, i32) {
    %c0_i32 = arith.constant 0 : i32
    %c0_i32_0 = arith.constant 0 : i32
    return %arg0, %arg1, %c0_i32 : i32, i32, i32
  }
  func.func @transform_13(%arg0: i32, %arg1: i32) -> (i32, i32, i32, i32) {
    %c0_i32 = arith.constant 0 : i32
    %c0_i32_0 = arith.constant 0 : i32
    %c0_i32_1 = arith.constant 0 : i32
    return %arg0, %c0_i32, %arg1, %c0_i32_0 : i32, i32, i32, i32
  }
}

</mosaic_0001>

<bundles_post_ra>
// kernel: mha_forward.1
= control target key start
LH: loop header
LB: loop body
LE: loop exit
PB: predicated region body
PF: predicated region fallthrough
CT: control target
= control target key end

     0   :  { %s2998_s0 = inlined_call_operand.vmem [shape: f32[2,8,64], index: 0, kind: input, shape index: {}]   ;;  %s2999_s1 = inlined_call_operand.vmem [shape: f32[2,8,64], index: 1, kind: input, shape index: {}]   ;;  %s3000_s2 = inlined_call_operand.hbm [shape: f32[2,8,64], index: 2, kind: input, shape index: {}]   ;;  %s3001_s3 = inlined_call_operand.hbm [shape: bf16[64,64], index: 3, kind: input, shape index: {}]   ;;  %s3002_s4 = inlined_call_operand.hbm [shape: bf16[64,64], index: 4, kind: input, shape index: {}]   ;;  %s3003_s5 = inlined_call_operand.hbm [shape: bf16[64,64], index: 5, kind: input, shape index: {}]   ;;  %s3004_s6 = inlined_call_operand.hbm [shape: bf16[64,64], index: 6, kind: input, shape index: {}]   ;;  %s3005_s7 = inlined_call_operand.vmem [shape: f32[1,64], index: 7, kind: input, shape index: {}]   ;;  %s3006_s8 = inlined_call_operand.hbm [shape: f32[1,64], index: 8, kind: input, shape index: {}]   ;;  %s3007_s9 = inlined_call_operand.hbm [shape: f32[1,64], index: 9, kind: input, shape index: {}]   ;;  %s3008_s10 = inlined_call_operand.hbm [shape: f32[1,64], index: 10, kind: input, shape index: {}]   ;;  %s3009_s11 = inlined_call_operand.vmem [shape: f32[1,8,8], index: 11, kind: input, shape index: {}]   ;;  %s3010_s12 = inlined_call_operand.hbm [shape: f32[2,8,64], index: 12, kind: output, shape index: {0}]   ;;  %s3011_s13 = inlined_call_operand.hbm [shape: f32[2,4,8,8], index: 13, kind: output, shape index: {1}]  }
   0x1   :  { %3020 = sst [smem:[#allocation29_spill]] %s3001_s3 }
   0x2   :  { %3021 = sst [smem:[#allocation30_spill]] %s3002_s4 }
   0x3   :  { %3022 = sst [smem:[#allocation31_spill]] %s3003_s5 }
   0x4   :  { %3023 = sst [smem:[#allocation32_spill]] %s3004_s6 }
   0x5   :  { %3024 = sst [smem:[#allocation33_spill]] %s3006_s8 }
   0x6   :  { %3025 = sst [smem:[#allocation34_spill]] %s3007_s9 }
   0x7   :  { %3026 = sst [smem:[#allocation35_spill]] %s3008_s10 }
   0x8   :  { %3027 = sst [smem:[#allocation36_spill]] %s3009_s11 }
   0x9   :  { %3028 = sst [smem:[#allocation37_spill]] %s3010_s12 }
   0xa   :  { %3029 = sst [smem:[#allocation38_spill]] %s3011_s13 }
   0xb   :  { %19 = vsyncpa [#allocation6], 0 }
   0xc   :  { %21 = vsyncpa [#allocation6 + $0x1], 0 }
   0xd   :  { %22 = vsyncpa [#allocation9], 0 }
   0xe   :  { %23 = vsyncpa [#allocation12], 0 }
   0xf   :  { %24 = vsyncpa [#allocation15], 0 }
  0x10   :  { %25 = vsyncpa [#allocation18], 0 }
  0x11   :  { %26 = vsyncpa [#allocation7], 0 }
  0x12   :  { %28 = vsyncpa [#allocation7 + $0x1], 0 }
  0x13   :  { %29 = vsyncpa [#allocation21], 0 }
  0x14   :  { %31 = vsyncpa [#allocation21 + $0x1], 0  ;;  %s2588_s25 = smov 0   ;;  %s2590_s26 = smov 0  }
  0x15   :  { %s2592_s27 = smov 0   ;;  %s2594_s28 = smov 0  }
  0x16   :  { %s2596_s29 = smov 0   ;;  %s2598_s30 = smov 0  }
  0x17 LB: > { %s3012_s14 = sadd.s32 4294967295, %s2494_s30   ;;  %p1758_p0 = scmp.ge.s32.totalorder %s2494_s30, 1  ;;  %s2494_s30 = sphi %s2598_s30, %s37_s30   ;;  %s2490_s29 = sphi %s2596_s29, %s3059_s29   ;;  %s2486_s28 = sphi %s2594_s28, %s3058_s28   ;;  %s2482_s27 = sphi %s2592_s27, %s3057_s27   ;;  %s2478_s26 = sphi %s2590_s26, %s3056_s26   ;;  %s2474_s25 = sphi %s2588_s25, %s3055_s25  }
  0x18   : > { %p2622_p1 = scmp.eq.s32.totalorder %s3012_s14, 0  ;;  %p384_p2 = scmp.lt.s32.totalorder %s2494_s30, 3 }
  0x19   : > { %s2496_s17 = smov [#allocation8]   ;;  %s2497_s20 = smov [#allocation11]  }
  0x1a   : > { %p2627_p3 = pnand %p1758_p0, %p384_p2  ;;  %s396_s18 = sshll.u32 %s2496_s17, 4  ;;  %s397_s18 = int_to_ptr.vmem [resolvable:$true] %s396_s18 }
  0x1b   : > { %s422_s21 = sshll.u32 %s2497_s20, 4  ;;  %s2498_s22 = smov [#allocation14]   ;;  %s423_s21 = int_to_ptr.vmem [resolvable:$true] %s422_s21 }
  0x1c   : > { %s3031_s16 = scalar_select %p2627_p3, 1, 0 }
  0x1d   : > { %p2004_p4 = pneg %p2627_p3  ;;  %s452_s23 = sshll.u32 %s2498_s22, 4  ;;  %s453_s23 = int_to_ptr.vmem [resolvable:$true] %s452_s23 }
  0x1e   : > { %s2169_s17 = scalar_lea.vmem %s397_s18, 512  ;;  %p2177_p11 = scmp.lt.s32.totalorder %s397_s18, %s397_s18 }
  0x1f   : > { %p2636_p6 = pnand %p2004_p4, %p2622_p1  ;;  %p2170_p8 = scmp.ne.s32.totalorder %s397_s18, %s2169_s17 }
  0x20   : > { %p2178_p12 = scmp.lt.s32.totalorder %s2169_s17, %s2169_s17 }
  0x21   : > { %p2642_p7 = pneg %p2636_p6 }
  0x22   : > { %p2179_p13 = por %p2178_p12, %p2177_p11 }
  0x23   : > { %p2172_p9 = pnand %p2170_p8, %p2642_p7 }
  0x25   : > { %p2173_p10 = pneg %p2172_p9 }
  0x27   : > { %p2180_p0 = pnand %p2179_p13, %p2173_p10 }
  0x29   : > { %2183 = shalt.err (!%p2180_p0)
}
  0x2a   : > { %s3015_s20 = smov 64   ;;  %s3017_s22 = smov 4  }
  0x2b   : > { %s3034_s3 = sld [smem:[#allocation29_spill]]  ;;  %s2195_s13 = scalar_lea.vmem %s423_s21, 512 }
  0x2c   : > { %p2196_p2 = scmp.ne.s32.totalorder %s423_s21, %s2195_s13  ;;  %p2203_p9 = scmp.lt.s32.totalorder %s423_s21, %s423_s21 }
  0x2d   : > { %p2204_p10 = scmp.lt.s32.totalorder %s2195_s13, %s2195_s13 }
  0x2e   : > { %p2198_p4 = pnand %p2196_p2, %p2642_p7 }
  0x2f   : > { %p2205_p11 = por %p2204_p10, %p2203_p9 }
  0x30   : > { %p2199_p8 = pneg %p2198_p4 }
  0x31   : > { %2007 = dma.hbm_to_vmem [thread:$0]  (!%p2636_p6), %s3034_s3, 512, %s397_s18, [#allocation9], %s3015_s20, %s3015_s20, %s3017_s22  }
  0x32   : > { %p2206_p12 = pnand %p2205_p11, %p2199_p8 }
  0x34   : > { %2209 = shalt.err (!%p2206_p12)
}
  0x35   : > { %s3035_s5 = sld [smem:[#allocation31_spill]]  ;;  %s2221_s12 = scalar_lea.vmem %s453_s23, 16 }
  0x36   : > { %p2222_p13 = scmp.ne.s32.totalorder %s453_s23, %s2221_s12  ;;  %s2228_s13 = scalar_lea.vmem %s453_s23, 32 }
  0x37   : > { %p2229_p4 = scmp.lt.s32.totalorder %s453_s23, %s453_s23  ;;  %p2230_p8 = scmp.lt.s32.totalorder %s2228_s13, %s2221_s12 }
  0x38   : > { %p2224_p0 = pnand %p2222_p13, %p2642_p7 }
  0x39   : > { %p2231_p9 = por %p2230_p8, %p2229_p4 }
  0x3a   : > { %p2225_p2 = pneg %p2224_p0 }
  0x3b   : > { %2013 = dma.hbm_to_vmem [thread:$0]  (!%p2636_p6), %s3035_s5, 512, %s423_s21, [#allocation12], %s3015_s20, %s3015_s20, %s3017_s22  }
  0x3c   : > { %p2232_p10 = pnand %p2231_p9, %p2225_p2 }
  0x3e   : > { %2235 = shalt.err (!%p2232_p10)
}
  0x3f   : > { %s3036_s8 = sld [smem:[#allocation33_spill]]  ;;  %s2501_s11 = smov [#allocation10]  }
  0x40   : > { %s409_s21 = sshll.u32 %s2501_s11, 4  ;;  %s2502_s17 = smov [#allocation13]   ;;  %s410_s21 = int_to_ptr.vmem [resolvable:$true] %s409_s21 }
  0x41   : > { %s435_s20 = sshll.u32 %s2502_s17, 4  ;;  %s2247_s22 = scalar_lea.vmem %s410_s21, 512  ;;  %s436_s20 = int_to_ptr.vmem [resolvable:$true] %s435_s20 }
  0x42   : > { %p2248_p11 = scmp.ne.s32.totalorder %s410_s21, %s2247_s22  ;;  %p2255_p0 = scmp.lt.s32.totalorder %s410_s21, %s410_s21 }
  0x43   : > { %p2256_p2 = scmp.lt.s32.totalorder %s2247_s22, %s2247_s22 }
  0x44   : > { %p2250_p12 = pnand %p2248_p11, %p2642_p7 }
  0x45   : > { %2019 = dma.hbm_to_vmem [thread:$0]  (!%p2636_p6), %s3036_s8, 16, %s453_s23, [#allocation15]  }
  0x46   : > { %p2251_p13 = pneg %p2250_p12  ;;  %p2257_p4 = por %p2256_p2, %p2255_p0 }
  0x48   : > { %p2258_p8 = pnand %p2257_p4, %p2251_p13 }
  0x4a   : > { %2261 = shalt.err (!%p2258_p8)
}
  0x4b   : > { %s3037_s12 = smov 4   ;;  %s3038_s13 = smov 64  }
  0x4c   : > { %s3039_s4 = sld [smem:[#allocation30_spill]]  ;;  %s2273_s18 = scalar_lea.vmem %s436_s20, 512 }
  0x4d   : > { %p2274_p9 = scmp.ne.s32.totalorder %s436_s20, %s2273_s18  ;;  %p2281_p12 = scmp.lt.s32.totalorder %s436_s20, %s436_s20 }
  0x4e   : > { %p2282_p0 = scmp.lt.s32.totalorder %s2273_s18, %s2273_s18 }
  0x4f   : > { %p2276_p10 = pnand %p2274_p9, %p2642_p7 }
  0x50   : > { %p2283_p13 = por %p2282_p0, %p2281_p12 }
  0x51   : > { %p2277_p11 = pneg %p2276_p10 }
  0x52   : > { %2010 = dma.hbm_to_vmem [thread:$0]  (!%p2636_p6), %s3039_s4, 512, %s410_s21, [#allocation9], %s3038_s13, %s3038_s13, %s3037_s12  }
  0x53   : > { %p2284_p2 = pnand %p2283_p13, %p2277_p11 }
  0x55   : > { %2287 = shalt.err (!%p2284_p2)
}
  0x56   : > { %s3040_s6 = sld [smem:[#allocation32_spill]]  ;;  %s2503_s21 = smov [#allocation16]  }
  0x57   : > { %s463_s17 = sshll.u32 %s2503_s21, 4  ;;  %s2504_s23 = smov [#allocation17]   ;;  %s464_s17 = int_to_ptr.vmem [resolvable:$true] %s463_s17 }
  0x58   : > { %s474_s14 = sshll.u32 %s2504_s23, 4  ;;  %s2299_s3 = scalar_lea.vmem %s464_s17, 16  ;;  %s475_s14 = int_to_ptr.vmem [resolvable:$true] %s474_s14 }
  0x59   : > { %p2300_p4 = scmp.ne.s32.totalorder %s464_s17, %s2299_s3  ;;  %s2306_s18 = scalar_lea.vmem %s464_s17, 32 }
  0x5a   : > { %p2307_p10 = scmp.lt.s32.totalorder %s464_s17, %s464_s17  ;;  %p2308_p11 = scmp.lt.s32.totalorder %s2306_s18, %s2299_s3 }
  0x5b   : > { %p2302_p8 = pnand %p2300_p4, %p2642_p7 }
  0x5c   : > { %2016 = dma.hbm_to_vmem [thread:$0]  (!%p2636_p6), %s3040_s6, 512, %s436_s20, [#allocation12], %s3038_s13, %s3038_s13, %s3037_s12  }
  0x5d   : > { %p2303_p9 = pneg %p2302_p8  ;;  %p2309_p12 = por %p2308_p11, %p2307_p10 }
  0x5f   : > { %p2310_p0 = pnand %p2309_p12, %p2303_p9 }
  0x61   : > { %2313 = shalt.err (!%p2310_p0)
}
  0x62   : > { %s3041_s9 = sld [smem:[#allocation34_spill]]  ;;  %s2325_s12 = scalar_lea.vmem %s475_s14, 16 }
  0x63   : > { %p2326_p13 = scmp.ne.s32.totalorder %s475_s14, %s2325_s12  ;;  %s2332_s13 = scalar_lea.vmem %s475_s14, 32 }
  0x64   : > { %p2333_p8 = scmp.lt.s32.totalorder %s475_s14, %s475_s14  ;;  %p2334_p5 = scmp.lt.s32.totalorder %s2332_s13, %s2325_s12 }
  0x65   : > { %p2328_p2 = pnand %p2326_p13, %p2642_p7 }
  0x66   : > { %p2335_p3 = por %p2334_p5, %p2333_p8 }
  0x67   : > { %p2329_p4 = pneg %p2328_p2 }
  0x68   : > { %2022 = dma.hbm_to_vmem [thread:$0]  (!%p2636_p6), %s3041_s9, 16, %s464_s17, [#allocation15]  }
  0x69   : > { %p2336_p10 = pnand %p2335_p3, %p2329_p4 }
  0x6b   : > { %2339 = shalt.err (!%p2336_p10)
}
  0x6c   : > { %s3042_s10 = sld [smem:[#allocation35_spill]]  ;;  %s1757_s24 = sadd.s32 4294967294, %s2494_s30  }
  0x6d   : > { %s49_s21 = sadd.s32 1, %s2490_s29  ;;  %s110_s19 = sadd.s32 1, %s2482_s27 }
  0x6e   : > { %p51_p3 = scmp.ge.s32.totalorder %s49_s21, 2  ;;  %p117_p5 = scmp.ne.s32.totalorder %s2482_s27, %s2478_s26 }
  0x6f   : > { %p118_p7 = scmp.eq.s32.totalorder %s2494_s30, 0  ;;  %p123_p9 = scmp.ne.s32.totalorder %s2478_s26, %s2474_s25 }
  0x70   : > { %s3061_s21 = smov (%p51_p3, %s49_s21), 0  ;;  %s3045_s18 = sadd.s32 4294967295, %s2494_s30  }
  0x71   : > { %p2717_p11 = por %p118_p7, %p117_p5  ;;  %p343_p12 = scmp.eq.s32.totalorder %s3045_s18, 1 }
  0x72   : > { %2025 = dma.hbm_to_vmem [thread:$0]  (!%p2636_p6), %s3042_s10, 16, %s475_s14, [#allocation18]  }
  0x73   : > { %p2723_p6 = por %p2622_p1, %p123_p9  ;;  %s107_s14 = ssub.s32 %s2490_s29, %s3061_s21 }
  0x74   : > { %p108_p0 = scmp.eq.s32.totalorder %s107_s14, 0  ;;  %p349_p13 = scmp.eq.s32.totalorder %s1757_s24, 1 }
  0x75   : > { %p2731_p2 = por %p343_p12, %p117_p5  ;;  %p2044_p4 = scmp.lt.s32.totalorder %s2494_s30, 2 }
  0x76   : > { %s2737_s20 = scalar_select %p108_p0, %s2482_s27, %s110_s19  }
  0x77   : > { %p2739_p8 = por %p349_p13, %p123_p9  ;;  %s509_s13 = sand.u32 1, %s2482_s27  }
  0x78   : > { %s1768_s3 = sshll.u32 %s509_s13, 3  ;;  %s1769_s11 = sshll.u32 %s2490_s29, 7 }
  0x79   : > { %s3047_s12 = scalar_select %p2739_p8, 1, 0 }
  0x7a   : > { %s518_s18 = scalar_lea.hbm %s3000_s2, %s1769_s11  ;;  %s513_s14 = scalar_lea.vmem [#allocation5], %s1768_s3 }
  0x7b   : > { %s520_s24 = sshll.u32 %s513_s14, 4  ;;  %p2750_p10 = pnand %p2044_p4, %p2717_p11  ;;  %s521_s24 = int_to_ptr.vmem [resolvable:$true] %s520_s24 }
  0x7c   : > { %s510_s19 = scalar_lea.sflag [#allocation6], %s509_s13  ;;  %s2353_s8 = scalar_lea.vmem %s521_s24, 128 }
  0x7d   : > { %p2342_p3 = pneg %p2750_p10  ;;  %p2354_p5 = scmp.ne.s32.totalorder %s521_s24, %s2353_s8 }
  0x7e   : > { %s2505_s9 = smov [#allocation5]  }
  0x7f   : > { %p2356_p7 = pnand %p2354_p5, %p2342_p3  ;;  %s2358_s10 = sshll.u32 %s2505_s9, 4  ;;  %s2359_s10 = int_to_ptr.vmem [resolvable:$false] %s2358_s10 }
  0x80   : > { %s2360_s4 = scalar_lea.vmem %s2359_s10, 256  ;;  %p2361_p12 = scmp.lt.s32.totalorder %s521_s24, %s2359_s10 }
  0x81   : > { %p2357_p9 = pneg %p2356_p7  ;;  %p2362_p0 = scmp.lt.s32.totalorder %s2360_s4, %s2353_s8 }
  0x83   : > { %p2363_p13 = por %p2362_p0, %p2361_p12 }
  0x85   : > { %p2364_p8 = pnand %p2363_p13, %p2357_p9 }
  0x87   : > { %2367 = shalt.err (!%p2364_p8)
}
  0x88   : > { %2029 = dma.hbm_to_vmem [thread:$0]  (!%p2750_p10), %s518_s18, 128, %s521_s24, %s510_s19  }
  0x89   : > { %p3049_p11 = scmp.ne.s32.totalorder %s3031_s16, 0 }
  0x8a   : > { %s2761_s5 = sand.u32 (!%p3049_p11), 1, %s2478_s26  }
  0x8b   : > { %529 = sbr.rel (%p3049_p11) target bundleno = 1963 (0x7ab), region = 68  ;;  %s1771_s9 = sshll.u32 (!%p3049_p11), %s2761_s5, 3 }
  0x8c   : > { %s532_s17 = scalar_lea.sflag (!%p3049_p11), [#allocation6], %s2761_s5  ;;  %s2767_s8 = scalar_lea.vmem (!%p3049_p11), [#allocation5], %s1771_s9 }
  0x90   : > { %2445 = dma.done.wait (%p2723_p6), %s532_s17, 128  }
  0x91   : > { %2447 = vsyncadd (%p2723_p6), %s532_s17, 4294967168 }
  0x92   : > { %2449 = dma.done.wait (%p2622_p1), [#allocation9], 1024  }
  0x93   : > { %2451 = vsyncadd (%p2622_p1), [#allocation9], 4294966272 }
  0x94   : > { %2453 = dma.done.wait (%p2622_p1), [#allocation12], 1024  }
  0x95   : > { %2455 = vsyncadd (%p2622_p1), [#allocation12], 4294966272 }
  0x96   : > { %2457 = dma.done.wait (%p2622_p1), [#allocation15], 32  }
  0x97   : > { %2459 = vsyncadd (%p2622_p1), [#allocation15], 4294967264 }
  0x98   : > { %2461 = dma.done.wait (%p2622_p1), [#allocation18], 16  }
  0x99   : > { %2463 = vsyncadd (%p2622_p1), [#allocation18], 4294967280  ;;  %v2506_v0 = vmov 0.0   ;;  %vm2507_vm0 = vmmov 0   ;;  %p626_p6 = scmp.lt.s32.totalorder %s2486_s28, 1  ;;  %v2120_v1 = vld [vmem:[#allocation10 + $0x18] sm:$0xff]  }
  0x9a   : > { %1874 = vmatprep.subr.bf16.mxu0 %v2506_v0  ;;  %1882 = vmatprep.mubr.msk.bf16.mxu0 %vm2507_vm0, %v2506_v0  ;;  %v2121_v2 = vld [vmem:[#allocation10 + $0x10] sm:$0xff]   ;;  %v2122_v3 = vld [vmem:[#allocation10 + $0x8] sm:$0xff]   ;;  %v2123_v4 = vld [vmem:[#allocation10] sm:$0xff]   ;;  %vm689_vm1 = vcmask 523264   ;;  %vm734_vm2 = vcmask 519168   ;;  %vm910_vm3 = vcmask 130048  }
  0x9b   : > { %1886 = vmatprep.subr.bf16.mxu1 %v2506_v0  ;;  %1894 = vmatprep.mubr.msk.bf16.mxu1 %vm2507_vm0, %v2506_v0  ;;  %s2797_s6 = scalar_select %p626_p6, %s2486_s28, 1  ;;  %v2128_v5 = vld [vmem:[#allocation11 + $0x18] sm:$0xff]   ;;  %v2129_v7 = vld [vmem:[#allocation11 + $0x10] sm:$0xff]   ;;  %v2126_v11 = vld [vmem:[#allocation8 + $0x8] sm:$0xff]   ;;  %vm975_vm4 = vcmask 1043456   ;;  %vm957_vm5 = vcmask 64512  }
  0x9c   : > { %1875 = vmatpush3.bf16.msra.mxu0 %v2120_v1  ;;  %1887 = vmatpush3.bf16.msra.mxu1 %v2128_v5  ;;  %v2124_v8 = vld [vmem:[#allocation8 + $0x18] sm:$0xff]   ;;  %v2125_v10 = vld [vmem:[#allocation8 + $0x10] sm:$0xff]   ;;  %v2127_v13 = vld [vmem:[#allocation8] sm:$0xff]   ;;  %s2508_s18 = smov 112   ;;  %s2509_s19 = smov 96   ;;  %vm1020_vm6 = vcmask 125952  }
  0x9d   : > { %1876 = vmatprep.subr.bf16.mxu0 %v2506_v0  ;;  %s1781_s10 = sshll.u32 %s2797_s6, 3  ;;  %1888 = vmatprep.subr.bf16.mxu1 %v2506_v0  ;;  %v2130_v15 = vld [vmem:[#allocation11 + $0x8] sm:$0xff]   ;;  %v2131_v16 = vld [vmem:[#allocation11] sm:$0xff]   ;;  %v648_v17 = vld [vmem:[%s2767_s8] sm:$0xff]  ;;  %s2510_s4 = smov 80   ;;  %vm1151_vm7 = vcmask 257152  }
  0x9e   : > { %s636_s23 = scalar_lea.vmem %s2999_s1, %s1781_s10  ;;  %s632_s11 = scalar_lea.vmem %s2998_s0, %s1781_s10  ;;  %v649_v18 = vpack.c.bf16 %v648_v17, %v648_v17  ;;  %v1783_v19 = vld [vmem:[#allocation14] ss:$0 sm:$0xff]  ;;  %v1795_v29 = vld [vmem:[%s3005_s7] ss:$0 sm:$0xff]  ;;  %v1789_v38 = vld [vmem:[#allocation16] ss:$0 sm:$0xff] }
  0x9f   : > { %v646_v6 = vld [vmem:[%s636_s23] sm:$0xff]  ;;  %s3050_s6 = sld [smem:[#allocation36_spill]]  ;;  %s1780_s10 = sshll.u32 %s2761_s5, 5  ;;  %vm1281_vm8 = vcmask 388352   ;;  %vm1411_vm9 = vcmask 519552  }
  0xa0   : > { %1877 = vmatpush3.bf16.msra.mxu0 %v2121_v2  ;;  %v647_v9 = vpack.c.bf16 %v646_v6, %v646_v6  ;;  %1889 = vmatpush3.bf16.msra.mxu1 %v2129_v7  ;;  %v820_v12 = vld [vmem:[%s632_s11] sm:$0xff]  ;;  %s2862_s15 = scalar_lea.vmem [#allocation20], %s1780_s10  ;;  %s2511_s16 = smov 16  }
  0xa1   : > { %1878 = vmatprep.subr.bf16.mxu0 %v2506_v0  ;;  %1890 = vmatprep.subr.bf16.mxu1 %v2506_v0  ;;  %v821_v14 = vpack.c.bf16 %v820_v12, %v820_v12  ;;  %s2512_s23 = smov 32   ;;  %s2513_s13 = smov 48  }
  0xa2   : > { %s1837_s3 = sshll.u32 %s2486_s28, 9  ;;  %s1531_s11 = sshll.u32 %s2862_s15, 4  ;;  %s2918_s11 = int_to_ptr.vmem [resolvable:$true] %s1531_s11 }
  0xa3   : > { %s3051_s24 = sld [smem:[#allocation38_spill]]  ;;  %s2368_s17 = scalar_lea.vmem %s2918_s11, 512 }
  0xa4   : > { %1879 = vmatpush3.bf16.msra.mxu0 %v2122_v3  ;;  %1891 = vmatpush3.bf16.msra.mxu1 %v2130_v15  ;;  %p2369_p1 = scmp.ne.s32.totalorder %s2918_s11, %s2368_s17  ;;  %s2514_s8 = smov [#allocation20]  }
  0xa5   : > { %1880 = vmatprep.subr.bf16.mxu0 %v2506_v0  ;;  %1892 = vmatprep.subr.bf16.mxu1 %v2506_v0  ;;  %v2848_v47 = vld [vmem:[%s3050_s6] sm:$0xff]  ;;  %s2372_s6 = sshll.u32 %s2514_s8, 4  ;;  %s2373_s6 = int_to_ptr.vmem [resolvable:$false] %s2372_s6 }
  0xa6   : > { %p2370_p4 = pnand %p2369_p1, %p2731_p2  ;;  %s2374_s10 = scalar_lea.vmem %s2373_s6, 1024 }
  0xa7   : > { %p2375_p10 = scmp.lt.s32.totalorder %s2918_s11, %s2373_s6  ;;  %p2376_p3 = scmp.lt.s32.totalorder %s2374_s10, %s2368_s17 }
  0xa8   : > { %1881 = vmatpush3.bf16.msra.mxu0 %v2123_v4  ;;  %1893 = vmatpush3.bf16.msra.mxu1 %v2131_v16  ;;  %p2371_p8 = pneg %p2370_p4 }
  0xa9   : > { %1898 = vmatprep.subr.bf16.mxu0 %v2506_v0  ;;  %1910 = vmatprep.subr.bf16.mxu1 %v2506_v0  ;;  %p2377_p5 = por %p2376_p3, %p2375_p10 }
  0xab   : > { %1883 = vmatmul.mubr.msk.bf16.vlgmr.msra.gmra.mxu0 %vm689_vm1, %v647_v9  ;;  %1895 = vmatmul.mubr.msk.bf16.vlgmr.msra.gmra.mxu1 %vm689_vm1, %v649_v18  ;;  %p2378_p7 = pnand %p2377_p5, %p2371_p8 }
  0xac   : > { %1899 = vmatpush3.bf16.msra.mxu0 %v2124_v8  ;;  %1906 = vmatprep.mubr.msk.bf16.mxu0 %vm2507_vm0, %v2506_v0 }
  0xad   : > { %1900 = vmatprep.subr.bf16.mxu0 %v2506_v0  ;;  %1912 = vmatprep.mubr.msk.bf16.mxu1 %vm2507_vm0, %v2506_v0 }
  0xb0   : > { %1901 = vmatpush3.bf16.msra.mxu0 %v2125_v10 }
  0xb1   : > { %1902 = vmatprep.subr.bf16.mxu0 %v2506_v0 }
  0xb4   : > { %1903 = vmatpush3.bf16.msra.mxu0 %v2126_v11 }
  0xb5   : > { %1904 = vmatprep.subr.bf16.mxu0 %v2506_v0 }
  0xb8   : > { %1905 = vmatpush3.bf16.msra.mxu0 %v2127_v13 }
  0xb9   : > { %1934 = vmatprep.subr.bf16.mxu0 %v2506_v0 }
  0xbb   : > { %1907 = vmatmul.mubr.msk.bf16.vlgmr.msra.gmra.mxu0 %vm689_vm1, %v821_v14 }
  0xbc   : > { %1936 = vmatprep.mubr.msk.bf16.mxu0 %vm2507_vm0, %v2506_v0 }
 0x16b   : > { %v727_v20 = vpop.f32.mrf.mxu0  ;;  %v812_v39 = vpop.f32.mrf.mxu1 }
 0x16c   : > { %v728_v21 = vadd.f32 %v1783_v19, %v727_v20  ;;  %v813_v40 = vadd.f32 %v1789_v38, %v812_v39 }
 0x16d   : > { %v1884_v22 = vpop.f32.mrf.mxu0  ;;  %v1896_v41 = vpop.f32.mrf.mxu1 }
 0x16e   : > { %v733_v23 = vpack.c.bf16 %v728_v21, %v728_v21  ;;  %v818_v42 = vpack.c.bf16 %v813_v40, %v813_v40 }
 0x16f   : > { %v730_v24 = vpop.f32.mrf.mxu0  ;;  %v815_v43 = vpop.f32.mrf.mxu1 }
 0x170   : > { %735 = vst.msk [vmem:[#allocation2] sm:$0xf] %vm734_vm2, %v733_v23  ;;  %819 = vst.msk [vmem:[#allocation3] sm:$0xf] %vm734_vm2, %v818_v42 }
 0x171   : > { %v1885_v25 = vpop.f32.mrf.mxu0  ;;  %v1897_v44 = vpop.f32.mrf.mxu1 }
 0x177   : > { %v908_v26 = vld [vmem:[#allocation2] sm:$0xf]  ;;  %v909_v45 = vld [vmem:[#allocation3] sm:$0xf] }
 0x178   : > { %v2132_v27 = vld [vmem:[#allocation2] ss:$0 sps:$4 sm:$0xff]   ;;  %v915_v28 = vsel %vm910_vm3, %v908_v26, 0  ;;  %v977_v46 = vsel %vm975_vm4, %v909_v45, 0 }
 0x179   : > { %1911 = vmatpush3.bf16.xpose.msra.mxu1 %v915_v28  ;;  %1030 = vrot.lane.b32.xlu1 %v2132_v27, %s2508_s18  ;;  %v2133_v37 = vld [vmem:[#allocation2] ss:$0 sps:$4 sm:$0xff]  }
 0x17a   : > { %1916 = vmatprep.subr.bf16.mxu1 %v2506_v0  ;;  %v2134_v59 = vld [vmem:[#allocation2] ss:$0 sps:$4 sm:$0xff]  }
 0x17b   : > { %v899_v30 = vpop.f32.mrf.mxu0 }
 0x17c   : > { %v900_v31 = vadd.f32 %v1795_v29, %v899_v30 }
 0x17d   : > { %v1908_v32 = vpop.f32.mrf.mxu0 }
 0x17e   : > { %v905_v33 = vmul.f32 0.25, %v900_v31 }
 0x17f   : > { %v902_v34 = vpop.f32.mrf.mxu0 }
 0x180   : > { %v906_v35 = vpack.c.bf16 %v905_v33, %v905_v33 }
 0x181   : > { %v1909_v36 = vpop.f32.mrf.mxu0 }
 0x182   : > { %1025 = vrot.lane.b32.xlu1 %v906_v35, %s2508_s18  ;;  %1913 = vmatmul.mubr.msk.bf16.vlgmr.msra.gmra.mxu1 %vm910_vm3, %v906_v35 }
 0x183   : > { %1918 = vmatprep.mubr.msk.bf16.mxu1 %vm2507_vm0, %v2506_v0  ;;  %1917 = vmatpush3.bf16.msra.mxu1 %v977_v46 }
 0x184   : > { %1922 = vmatprep.subr.bf16.mxu1 %v2506_v0 }
 0x186   : > { %1155 = vrot.lane.b32.xlu1 %v906_v35, %s2509_s19 }
 0x18a   : > { %1290 = vrot.lane.b32.xlu1 %v2133_v37, %s2510_s4 }
 0x18e   : > { %1285 = vrot.lane.b32.xlu1 %v906_v35, %s2510_s4 }
 0x1eb   : > { %v1031_v60 = vpop.permute.xlu1 %1030 }
 0x1ec   : > { %v1036_v8 = vsel %vm910_vm3, %v1031_v60, 0 }
 0x1f4   : > { %v1026_v61 = vpop.permute.xlu1 %1025 }
 0x1f8   : > { %v1156_v63 = vpop.permute.xlu1 %1155 }
 0x1fc   : > { %v1291_v3 = vpop.permute.xlu1 %1290 }
 0x1fd   : > { %v1296_v4 = vsel %vm910_vm3, %v1291_v3, 0 }
 0x200   : > { %v1286_v9 = vpop.permute.xlu1 %1285 }
 0x242   : > { %v951_v48 = vpop.f32.mrf.mxu1 }
 0x243   : > { %v952_v49 = vadd.f32 %v951_v48, %v2848_v47 }
 0x244   : > { %v1914_v50 = vpop.f32.mrf.mxu1 }
 0x245   : > { %v958_v51 = vsel %vm957_vm5, %v952_v49, -inf  ;;  %v2137_v50 = vld [vmem:[#allocation3] ss:$0 sps:$4 sm:$0xff]  }
 0x246   : > { %959 = vmax.xlane.f32.xlu0 %v958_v51  ;;  %v954_v52 = vpop.f32.mrf.mxu1 }
 0x248   : > { %v1915_v53 = vpop.f32.mrf.mxu1 }
 0x2cf   : > { %v960_v54 = vpop.xlane.xlu0 %959 }
 0x2d0   : > { %v961_v55 = vsub.f32 %v952_v49, %v960_v54  ;;  %v2136_v49 = vld [vmem:[#allocation3] ss:$0 sps:$4 sm:$0xff]  }
 0x2d2   : > { %v962_v56 = vmul.f32 1.442695, %v961_v55 }
 0x2d4   : > { %2142 = vpow2.f32 %v962_v56 }
 0x2e1   : > { %v2143_v57 = vpop.eup %2142 }
 0x2e2   : > { %v964_v58 = vsel %vm957_vm5, %v2143_v57, 0.0 }
 0x2e3   : > { %965 = vadd.xlane.f32.xlu0 %v964_v58 }
 0x2f9   : > { %1160 = vrot.lane.b32.xlu0 %v2134_v59, %s2509_s19 }
 0x36c   : > { %v966_v62 = vpop.xlane.xlu0 %965 }
 0x36d   : > { %2144 = vrcp.f32 %v966_v62 }
 0x370   : > { %v1161_v1 = vpop.permute.xlu0 %1160 }
 0x371   : > { %v1166_v2 = vsel %vm910_vm3, %v1161_v1, 0 }
 0x372   : > { %1935 = vmatpush3.bf16.xpose.msra.mxu0 %v1166_v2 }
 0x373   : > { %1946 = vmatprep.subr.bf16.mxu0 %v2506_v0 }
 0x379   : > { %1937 = vmatmul.mubr.msk.bf16.vlgmr.msra.gmra.mxu0 %vm910_vm3, %v1156_v63 }
 0x37a   : > { %v2145_v5 = vpop.eup %2144  ;;  %1947 = vmatpush3.bf16.xpose.msra.mxu0 %v1296_v4  ;;  %1948 = vmatprep.mubr.msk.bf16.mxu0 %vm2507_vm0, %v2506_v0 }
 0x37b   : > { %v969_v6 = vmul.f32 %v2145_v5, %v2143_v57  ;;  %1958 = vmatprep.subr.bf16.mxu0 %v2506_v0 }
 0x37d   : > { %970 = vst.msk [vmem:[%s2862_s15] sm:$0xff] %vm957_vm5, %v969_v6  ;;  %v971_v7 = vpack.c.bf16 %v969_v6, %v969_v6  ;;  %v2138_v6 = vld [vmem:[#allocation13 + $0x18] sm:$0xff]  }
 0x37f   : > { %1919 = vmatmul.mubr.msk.bf16.vlgmr.msra.gmra.mxu1 %vm957_vm5, %v971_v7 }
 0x380   : > { %1923 = vmatpush3.bf16.xpose.msra.mxu1 %v1036_v8  ;;  %1924 = vmatprep.mubr.msk.bf16.mxu1 %vm2507_vm0, %v2506_v0  ;;  %v2139_v8 = vld [vmem:[#allocation13 + $0x10] sm:$0xff]  }
 0x381   : > { %1949 = vmatmul.mubr.msk.bf16.vlgmr.msra.gmra.mxu0 %vm910_vm3, %v1286_v9  ;;  %1928 = vmatprep.subr.bf16.mxu1 %v2506_v0 }
 0x382   : > { %1966 = vmatprep.mubr.msk.bf16.mxu0 %vm2507_vm0, %v2506_v0  ;;  %1959 = vmatpush3.bf16.msra.mxu0 %v2138_v6 }
 0x383   : > { %1960 = vmatprep.subr.bf16.mxu0 %v2506_v0 }
 0x386   : > { %1961 = vmatpush3.bf16.msra.mxu0 %v2139_v8 }
 0x387   : > { %1925 = vmatmul.mubr.msk.bf16.vlgmr.msra.gmra.mxu1 %vm910_vm3, %v1026_v61  ;;  %1962 = vmatprep.subr.bf16.mxu0 %v2506_v0 }
 0x388   : > { %1930 = vmatprep.mubr.msk.bf16.mxu1 %vm2507_vm0, %v2506_v0 }
 0x439   : > { %v1202_v10 = vpop.f32.mrf.mxu0 }
 0x43a   : > { %v1203_v11 = vadd.f32 %v1202_v10, %v2848_v47 }
 0x43b   : > { %v1938_v12 = vpop.f32.mrf.mxu0 }
 0x43c   : > { %v1208_v13 = vsel %vm957_vm5, %v1203_v11, -inf }
 0x43d   : > { %1209 = vmax.xlane.f32.xlu0 %v1208_v13  ;;  %v1205_v14 = vpop.f32.mrf.mxu0  ;;  %v2140_v13 = vld [vmem:[#allocation13 + $0x8] sm:$0xff]  }
 0x43e   : > { %1963 = vmatpush3.bf16.msra.mxu0 %v2140_v13 }
 0x43f   : > { %v1013_v15 = vpop.f32.mrf.mxu1  ;;  %v1939_v16 = vpop.f32.mrf.mxu0  ;;  %1964 = vmatprep.subr.bf16.mxu0 %v2506_v0 }
 0x440   : > { %v1019_v17 = vpack.c.bf16 %v1013_v15, %v1013_v15  ;;  %v2141_v15 = vld [vmem:[#allocation13] sm:$0xff]  }
 0x441   : > { %v1920_v18 = vpop.f32.mrf.mxu1  ;;  %v1332_v19 = vpop.f32.mrf.mxu0 }
 0x442   : > { %1021 = vst.msk [vmem:[#allocation4] sm:$0xf] %vm1020_vm6, %v1019_v17  ;;  %v1333_v28 = vadd.f32 %v1332_v19, %v2848_v47  ;;  %1965 = vmatpush3.bf16.msra.mxu0 %v2141_v15 }
 0x443   : > { %v1016_v20 = vpop.f32.mrf.mxu1  ;;  %v1950_v21 = vpop.f32.mrf.mxu0 }
 0x444   : > { %v1338_v32 = vsel %vm957_vm5, %v1333_v28, -inf }
 0x445   : > { %v1921_v22 = vpop.f32.mrf.mxu1  ;;  %v1335_v23 = vpop.f32.mrf.mxu0 }
 0x447   : > { %v1072_v24 = vpop.f32.mrf.mxu1  ;;  %v1951_v25 = vpop.f32.mrf.mxu0 }
 0x448   : > { %v1073_v26 = vadd.f32 %v1072_v24, %v2848_v47  ;;  %v2135_v47 = vld [vmem:[#allocation3] ss:$0 sps:$4 sm:$0xff]  }
 0x449   : > { %v1926_v27 = vpop.f32.mrf.mxu1 }
 0x44a   : > { %v1078_v29 = vsel %vm957_vm5, %v1073_v26, -inf }
 0x44b   : > { %1079 = vmax.xlane.f32.xlu1 %v1078_v29  ;;  %v1075_v30 = vpop.f32.mrf.mxu1 }
 0x44d   : > { %v1927_v31 = vpop.f32.mrf.mxu1 }
 0x44f   : > { %1339 = vmax.xlane.f32.xlu1 %v1338_v32 }
 0x4c6   : > { %v1210_v33 = vpop.xlane.xlu0 %1209 }
 0x4c7   : > { %v1211_v34 = vsub.f32 %v1203_v11, %v1210_v33 }
 0x4c9   : > { %v1212_v35 = vmul.f32 1.442695, %v1211_v34 }
 0x4cb   : > { %2146 = vpow2.f32 %v1212_v35 }
 0x4d4   : > { %v1080_v36 = vpop.xlane.xlu1 %1079 }
 0x4d5   : > { %v1081_v37 = vsub.f32 %v1073_v26, %v1080_v36 }
 0x4d7   : > { %v1082_v42 = vmul.f32 1.442695, %v1081_v37 }
 0x4d8   : > { %v2147_v38 = vpop.eup %2146  ;;  %v1340_v39 = vpop.xlane.xlu1 %1339 }
 0x4d9   : > { %v1341_v40 = vsub.f32 %v1333_v28, %v1340_v39  ;;  %v1214_v41 = vsel %vm957_vm5, %v2147_v38, 0.0 }
 0x4da   : > { %1215 = vadd.xlane.f32.xlu0 %v1214_v41 }
 0x4db   : > { %v1342_v43 = vmul.f32 1.442695, %v1341_v40 }
 0x4dd   : > { %2148 = vpow2.f32 %v1342_v43 }
 0x4de   : > { %2150 = vpow2.f32 %v1082_v42 }
 0x4ea   : > { %v2149_v44 = vpop.eup %2148 }
 0x4eb   : > { %v1344_v45 = vsel %vm957_vm5, %v2149_v44, 0.0  ;;  %v2151_v46 = vpop.eup %2150 }
 0x4ec   : > { %1345 = vadd.xlane.f32.xlu1 %v1344_v45  ;;  %v1084_v48 = vsel %vm957_vm5, %v2151_v46, 0.0 }
 0x4f0   : > { %1096 = vrot.lane.b32.xlu0 %v2135_v47, %s2508_s18  ;;  %1085 = vadd.xlane.f32.xlu1 %v1084_v48 }
 0x501   : > { %1226 = vrot.lane.b32.xlu1 %v2136_v49, %s2509_s19  ;;  %s2916_s19 = scalar_lea.hbm %s3051_s24, %s1837_s3 }
 0x505   : > { %1356 = vrot.lane.b32.xlu1 %v2137_v50, %s2510_s4  ;;  %s1503_s4 = scalar_lea.sflag [#allocation21], %s2761_s5 }
 0x563   : > { %v1216_v51 = vpop.xlane.xlu0 %1215 }
 0x564   : > { %2152 = vrcp.f32 %v1216_v51 }
 0x567   : > { %v1097_v52 = vpop.permute.xlu0 %1096 }
 0x568   : > { %v1102_v53 = vsel %vm975_vm4, %v1097_v52, 0 }
 0x569   : > { %1929 = vmatpush3.bf16.msra.mxu1 %v1102_v53 }
 0x56a   : > { %1940 = vmatprep.subr.bf16.mxu1 %v2506_v0 }
 0x571   : > { %v2153_v54 = vpop.eup %2152 }
 0x572   : > { %v1219_v55 = vmul.f32 %v2153_v54, %v2147_v38 }
 0x574   : > { %1811 = vst.msk [vmem:[%s2862_s15 + $0x10] sm:$0xff] %vm957_vm5, %v1219_v55  ;;  %v1222_v3 = vpack.c.bf16 %v1219_v55, %v1219_v55 }
 0x575   : > { %v1346_v56 = vpop.xlane.xlu1 %1345 }
 0x576   : > { %2154 = vrcp.f32 %v1346_v56 }
 0x579   : > { %v1086_v57 = vpop.xlane.xlu1 %1085 }
 0x57a   : > { %2156 = vrcp.f32 %v1086_v57 }
 0x57d   : > { %v1227_v62 = vpop.permute.xlu1 %1226 }
 0x57e   : > { %v1232_v1 = vsel %vm975_vm4, %v1227_v62, 0 }
 0x581   : > { %v1357_v2 = vpop.permute.xlu1 %1356 }
 0x582   : > { %v1362_v4 = vsel %vm975_vm4, %v1357_v2, 0 }
 0x583   : > { %v2155_v58 = vpop.eup %2154 }
 0x584   : > { %v1349_v59 = vmul.f32 %v2155_v58, %v2149_v44 }
 0x586   : > { %1817 = vst.msk [vmem:[%s2862_s15 + $0x18] sm:$0xff] %vm957_vm5, %v1349_v59  ;;  %v1352_v5 = vpack.c.bf16 %v1349_v59, %v1349_v59 }
 0x587   : > { %v2157_v60 = vpop.eup %2156 }
 0x588   : > { %v1089_v61 = vmul.f32 %v2157_v60, %v2151_v46 }
 0x58a   : > { %1805 = vst.msk [vmem:[%s2862_s15 + $0x8] sm:$0xff] %vm957_vm5, %v1089_v61  ;;  %v1092_v63 = vpack.c.bf16 %v1089_v61, %v1089_v61 }
 0x58c   : > { %1931 = vmatmul.mubr.msk.bf16.vlgmr.msra.gmra.mxu1 %vm957_vm5, %v1092_v63 }
 0x58d   : > { %1941 = vmatpush3.bf16.msra.mxu1 %v1232_v1  ;;  %1942 = vmatprep.mubr.msk.bf16.mxu1 %vm2507_vm0, %v2506_v0 }
 0x58e   : > { %1952 = vmatprep.subr.bf16.mxu1 %v2506_v0 }
 0x594   : > { %1943 = vmatmul.mubr.msk.bf16.vlgmr.msra.gmra.mxu1 %vm957_vm5, %v1222_v3 }
 0x595   : > { %1953 = vmatpush3.bf16.msra.mxu1 %v1362_v4  ;;  %1954 = vmatprep.mubr.msk.bf16.mxu1 %vm2507_vm0, %v2506_v0 }
 0x59c   : > { %1955 = vmatmul.mubr.msk.bf16.vlgmr.msra.gmra.mxu1 %vm957_vm5, %v1352_v5 }
 0x64c   : > { %v1138_v7 = vpop.f32.mrf.mxu1 }
 0x64d   : > { %v1834_v9 = vpack.c.bf16 %v1138_v7, %v1138_v7 }
 0x64e   : > { %v1932_v10 = vpop.f32.mrf.mxu1 }
 0x64f   : > { %1148 = vrot.lane.b32.xlu0 %v1834_v9, %s2511_s16 }
 0x650   : > { %v1141_v11 = vpop.f32.mrf.mxu1 }
 0x652   : > { %v1933_v12 = vpop.f32.mrf.mxu1 }
 0x654   : > { %v1268_v14 = vpop.f32.mrf.mxu1 }
 0x655   : > { %v1835_v16 = vpack.c.bf16 %v1268_v14, %v1268_v14 }
 0x656   : > { %v1944_v17 = vpop.f32.mrf.mxu1 }
 0x657   : > { %1278 = vrot.lane.b32.xlu1 %v1835_v16, %s2512_s23 }
 0x658   : > { %v1271_v18 = vpop.f32.mrf.mxu1 }
 0x65a   : > { %v1945_v19 = vpop.f32.mrf.mxu1 }
 0x65c   : > { %v1398_v20 = vpop.f32.mrf.mxu1 }
 0x65d   : > { %v1836_v21 = vpack.c.bf16 %v1398_v20, %v1398_v20 }
 0x65e   : > { %v1956_v22 = vpop.f32.mrf.mxu1 }
 0x65f   : > { %1408 = vrot.lane.b32.xlu0 %v1836_v21, %s2513_s13 }
 0x660   : > { %v1401_v23 = vpop.f32.mrf.mxu1 }
 0x662   : > { %v1957_v24 = vpop.f32.mrf.mxu1 }
 0x6c1   : > { %v1149_v25 = vpop.permute.xlu0 %1148 }
 0x6c2   : > { %1152 = vst.msk [vmem:[#allocation4] sm:$0xf] %vm1151_vm7, %v1149_v25 }
 0x6c9   : > { %v1279_v0 = vpop.permute.xlu1 %1278 }
 0x6ca   : > { %1282 = vst.msk [vmem:[#allocation4] sm:$0xf] %vm1281_vm8, %v1279_v0 }
 0x6d1   : > { %v1409_v26 = vpop.permute.xlu0 %1408 }
 0x6d2   : > { %1412 = vst.msk [vmem:[#allocation4] sm:$0xf] %vm1411_vm9, %v1409_v26 }
 0x6d9   : > { %v1413_v27 = vld [vmem:[#allocation4] sm:$0xf] }
 0x6da   : > { %1967 = vmatmul.mubr.msk.bf16.vlgmr.msra.gmra.mxu0 %vm689_vm1, %v1413_v27 }
 0x6db   : > { %2381 = shalt.err (!%p2378_p7)
}
 0x6dc   : > { %s2382_s15 = scalar_lea.hbm %s2916_s19, 512  ;;  %s2386_s13 = scalar_lea.hbm %s3051_s24, 1024 }
 0x6dd   : > { %p2383_p9 = scmp.ne.s32.totalorder %s2916_s19, %s2382_s15  ;;  %p2387_p13 = scmp.lt.s32.totalorder %s2916_s19, %s3051_s24 }
 0x6de   : > { %p2388_p11 = scmp.lt.s32.totalorder %s2386_s13, %s2382_s15 }
 0x6df   : > { %p2384_p12 = pnand %p2383_p9, %p2731_p2 }
 0x6e0   : > { %p2389_p6 = por %p2388_p11, %p2387_p13 }
 0x6e1   : > { %p2385_p0 = pneg %p2384_p12 }
 0x6e3   : > { %p2390_p1 = pnand %p2389_p6, %p2385_p0 }
 0x6e5   : > { %2393 = shalt.err (!%p2390_p1)
}
 0x6e6   : > { %s2515_s14 = smov 128   ;;  %s2516_s17 = smov 8   ;;  %v1821_v28 = vld [vmem:[#allocation17] ss:$0 sm:$0xff] }
 0x6e7   : > { %2001 = dma.vmem_to_hbm [thread:$0]  (%p2731_p2), %s2918_s11, 512, %s2916_s19, %s1503_s4, %s2515_s14, %s2515_s14, %s2516_s17  }
 0x6e8   : > { %s1829_s8 = sshll.u32 %s2486_s28, 7  ;;  %s618_s6 = scalar_lea.vmem [#allocation19], %s1771_s9 }
 0x6e9   : > { %s1517_s10 = sshll.u32 %s618_s6, 4  ;;  %s3052_s23 = sld [smem:[#allocation37_spill]]  ;;  %s2951_s10 = int_to_ptr.vmem [resolvable:$true] %s1517_s10 }
 0x6ea   : > { %s1498_s28 = scalar_lea.sflag [#allocation7], %s2761_s5  ;;  %s2394_s11 = scalar_lea.vmem %s2951_s10, 128 }
 0x6eb   : > { %p2395_p4 = scmp.ne.s32.totalorder %s2951_s10, %s2394_s11  ;;  %s2517_s9 = smov [#allocation19]  }
 0x6ec   : > { %s2398_s19 = sshll.u32 %s2517_s9, 4  ;;  %s2399_s19 = int_to_ptr.vmem [resolvable:$false] %s2398_s19 }
 0x6ed   : > { %p2396_p8 = pnand %p2395_p4, %p2731_p2  ;;  %s2400_s4 = scalar_lea.vmem %s2399_s19, 256 }
 0x6ee   : > { %p2401_p3 = scmp.lt.s32.totalorder %s2951_s10, %s2399_s19  ;;  %p2402_p5 = scmp.lt.s32.totalorder %s2400_s4, %s2394_s11 }
 0x6ef   : > { %s2949_s13 = scalar_lea.hbm %s3052_s23, %s1829_s8  ;;  %p2397_p10 = pneg %p2396_p8 }
 0x6f0   : > { %p2403_p7 = por %p2402_p5, %p2401_p3 }
 0x6f2   : > { %p2404_p9 = pnand %p2403_p7, %p2397_p10 }
 0x79a   : > { %v1490_v29 = vpop.f32.mrf.mxu0 }
 0x79b   : > { %v1491_v30 = vadd.f32 %v1821_v28, %v1490_v29 }
 0x79c   : > { %v1968_v31 = vpop.f32.mrf.mxu0 }
 0x79d   : > { %1496 = vst.msk [vmem:[%s618_s6] sm:$0xff] %vm689_vm1, %v1491_v30 }
 0x79e   : > { %v1493_v32 = vpop.f32.mrf.mxu0 }
 0x79f   : > { %2407 = shalt.err (!%p2404_p9)
}
 0x7a0   : > { %s2408_s3 = scalar_lea.hbm %s2949_s13, 128  ;;  %s2412_s14 = scalar_lea.hbm %s3052_s23, 256 }
 0x7a1   : > { %p2409_p12 = scmp.ne.s32.totalorder %s2949_s13, %s2408_s3  ;;  %p2413_p11 = scmp.lt.s32.totalorder %s2949_s13, %s3052_s23 }
 0x7a2   : > { %p2414_p6 = scmp.lt.s32.totalorder %s2412_s14, %s2408_s3 }
 0x7a3   : > { %p2410_p0 = pnand %p2409_p12, %p2731_p2 }
 0x7a4   : > { %p2415_p1 = por %p2414_p6, %p2413_p11 }
 0x7a5   : > { %p2411_p13 = pneg %p2410_p0 }
 0x7a7   : > { %p2416_p4 = pnand %p2415_p1, %p2411_p13 }
 0x7a9   : > { %2419 = shalt.err (!%p2416_p4)
}
 0x7aa   : > { %2000 = dma.vmem_to_hbm [thread:$0]  (%p2731_p2), %s2951_s10, 128, %s2949_s13, %s1498_s28   ;;  %v1969_v33 = vpop.f32.mrf.mxu0 }
 0x7ab PF: > { %s1546_s6 = sand.u32 1, %s2474_s25   ;;  %p3053_p8 = scmp.ne.s32.totalorder %s3047_s12, 0 }
 0x7ac   : > { %p3054_p10 = scmp.ge.s32.totalorder %s2494_s30, 2  ;;  %s1547_s15 = scalar_lea.sflag [#allocation7], %s1546_s6 }
 0x7ae   : > { %p2031_p3 = pnand %p3054_p10, %p3053_p8 }
 0x7b0   : > { %p2032_p5 = pneg %p2031_p3 }
 0x7b2   : > { %2465 = dma.done.wait (%p2032_p5), %s1547_s15, 128  }
 0x7b3   : > { %2467 = vsyncadd (%p2032_p5), %s1547_s15, 4294967168  ;;  %s1556_s16 = scalar_lea.sflag [#allocation21], %s1546_s6 }
 0x7b4   : > { %2469 = dma.done.wait (%p2032_p5), %s1556_s16, 512  }
 0x7b5   : > { %2471 = vsyncadd (%p2032_p5), %s1556_s16, 4294966784  ;;  %s37_s30 = sadd.s32 1, %s2494_s30   ;;  %s3055_s25 = smov %s2478_s26 }
 0x7b6   : > { %p34_p7 = scmp.ge.s32.totalorder %s37_s30, 4   ;;  %s3056_s26 = smov %s2482_s27 }
 0x7b7   : > { %s3057_s27 = smov %s2737_s20  ;;  %s3058_s28 = smov %s2490_s29 }
 0x7b8   : > { %s3059_s29 = smov %s3061_s21  ;;  %36 = sbr.rel (!%p34_p7) target bundleno = 23 (0x17), region = 174 }
 0x7bd   :  { %1561 = vsyncpa [#allocation6], 1 }
 0x7be   :  { %1563 = vsyncpa [#allocation6 + $0x1], 1 }
 0x7bf   :  { %1564 = vsyncpa [#allocation9], 1 }
 0x7c0   :  { %1565 = vsyncpa [#allocation12], 1 }
 0x7c1   :  { %1566 = vsyncpa [#allocation15], 1 }
 0x7c2   :  { %1567 = vsyncpa [#allocation18], 1 }
 0x7c3   :  { %1568 = vsyncpa [#allocation7], 1 }
 0x7c4   :  { %1570 = vsyncpa [#allocation7 + $0x1], 1 }
 0x7c5   :  { %1571 = vsyncpa [#allocation21], 1 }
 0x7c6   :  { %1573 = vsyncpa [#allocation21 + $0x1], 1 }

</bundles_post_ra>
